<compile_context>
chip_gen: v7x
topology: tpu7x:2x2x1
jax: 0.10.0
libtpu: 0.0.40
codegen_flags: <defaults>
</compile_context>

<pallas_src>
import math

import jax
import jax.numpy as jnp
from jax.experimental import pallas as pl
from jax.experimental.pallas import tpu as pltpu


_GELU_C = math.sqrt(2.0 / math.pi)


def _make_ffn_kernel(eps: float, gelu_bf16: bool):
    def ffn_kernel(x_ref, w1_ref, b1_ref, w2_ref, b2_ref, g_ref, beta_ref, o_ref):
        x_f32 = x_ref[...].astype(jnp.float32)        # residual path (f32)
        x_bf16 = x_ref[...].astype(jnp.bfloat16)      # matmul input (bf16 MXU rate)

        # layer_1: bf16 x bf16 -> f32 accumulation on the MXU
        h = jnp.dot(x_bf16, w1_ref[...], preferred_element_type=jnp.float32)
        h = h + b1_ref[...]                           # (tm, d_inner), f32

        # OpenAI-GPT style (tanh-approx) gelu, as used by XLNet.
        # cubic restructured as h * (1 + 0.044715*h*h) to drop one multiply.
        if gelu_bf16:
            # v6e/v7x: bf16 VPU/EUP -> halve VALU/EUP pressure on the cdf.
            hb = h.astype(jnp.bfloat16)
            inner = hb * (1.0 + 0.044715 * (hb * hb))          # bf16
            cdf = 0.5 * (1.0 + jnp.tanh(_GELU_C * inner))      # bf16 (EUP tanh)
            h_act = h * cdf.astype(jnp.float32)                # final mul in f32
        else:
            # v5e: no bf16 VALU/EUP; keep everything f32 (hidden under the MXU).
            inner = h * (1.0 + 0.044715 * (h * h))
            cdf = 0.5 * (1.0 + jnp.tanh(_GELU_C * inner))
            h_act = h * cdf
        h_bf = h_act.astype(jnp.bfloat16)             # downcast before 2nd matmul

        # layer_2: bf16 x bf16 -> f32 accumulation
        y = jnp.dot(h_bf, w2_ref[...], preferred_element_type=jnp.float32)
        y = y + b2_ref[...]                           # (tm, d_model), f32

        # residual + LayerNorm over the feature dim (all f32)
        z = y + x_f32
        mu = jnp.mean(z, axis=-1, keepdims=True)
        zc = z - mu
        var = jnp.mean(zc * zc, axis=-1, keepdims=True)
        zn = zc * jax.lax.rsqrt(var + eps)
        o_ref[...] = (zn * g_ref[...] + beta_ref[...]).astype(o_ref.dtype)

    return ffn_kernel


def _round_up(x, m):
    return (x + m - 1) // m * m


def _tpu_info():
    """Device generation + physical VMEM capacity (with safe fallbacks)."""
    kind = ""
    try:
        kind = jax.devices()[0].device_kind.lower()
    except Exception:
        pass
    vmem_cap = None
    try:
        vmem_cap = int(pltpu.get_tpu_info().vmem_capacity_bytes)
    except Exception:
        vmem_cap = None
    if not vmem_cap or vmem_cap <= 0:
        vmem_cap = (64 << 20) if "v7" in kind else (128 << 20)
    two_cores = "v7" in kind                       # 2 TensorCores share the grid
    gelu_bf16 = ("v6" in kind) or ("v7" in kind)   # bf16 VPU/EUP; f32 on v5e
    return kind, vmem_cap, two_cores, gelu_bf16


def _vmem_estimate(tm, d_model, d_inner, in_itemsize, single_buffer_params):
    """Approximate VMEM footprint for one grid step (bytes)."""
    nbuf = 1 if single_buffer_params else 2
    stream = 2 * 2 * tm * d_model * max(in_itemsize, 4)   # x tile + out tile, double-buffered
    weights = nbuf * 2 * d_model * d_inner * 2            # W1 + W2 (bf16), resident
    small = nbuf * (d_inner + 3 * d_model) * 4            # biases + LN params (f32)
    live = tm * d_inner * (4 + 2) + 2 * tm * d_model * 4  # f32/bf16 hidden + y/z f32
    return stream + weights + small + live


def _param_spec(shape, single_buffer):
    """Constant-index BlockSpec; single-buffered when the API supports it."""
    idx_map = lambda i: (0,) * len(shape)
    if single_buffer and hasattr(pl, "Buffered"):
        try:
            return pl.BlockSpec(shape, idx_map, pipeline_mode=pl.Buffered(1))
        except TypeError:
            pass
    return pl.BlockSpec(shape, idx_map)


def prepare_xlnet_ffn_params(w1, b1, w2, b2, gamma, beta):
    """Cast/reshape parameters ONCE (hoisted out of the per-call path)."""
    d_model, d_inner = w1.shape
    return {
        "w1": w1.astype(jnp.bfloat16),
        "w2": w2.astype(jnp.bfloat16),
        "b1": b1.astype(jnp.float32).reshape(1, d_inner),
        "b2": b2.astype(jnp.float32).reshape(1, d_model),
        "gamma": gamma.astype(jnp.float32).reshape(1, d_model),
        "beta": beta.astype(jnp.float32).reshape(1, d_model),
    }


def xlnet_ffn(inp, params, *, eps=1e-12, tm=None):
    """XLNet feed-forward block.  inp: (seq, batch, d_model); returns same shape/dtype."""
    seq, bsz, d_model = inp.shape
    d_inner = params["w1"].shape[1]
    n_tok = seq * bsz
    itemsize = jnp.dtype(inp.dtype).itemsize

    _, vmem_cap, two_cores, gelu_bf16 = _tpu_info()
    hard_cap = max(vmem_cap - (8 << 20), 24 << 20)   # leave ~8 MiB compiler scratch

    # Generation-aware token tile: multiple of 128, shrink until it fits the part.
    tile = 512 if tm is None else tm
    tile = max(128, _round_up(tile, 128))
    while tile > 128 and _vmem_estimate(tile, d_model, d_inner, itemsize, True) + (8 << 20) > hard_cap:
        tile = max(128, _round_up(tile // 2, 128))
    tile = min(tile, _round_up(n_tok, 128))
    # On 2-TC parts (v7x) make sure the "parallel" grid axis has >= 2 steps.
    if two_cores and n_tok > 128 and _round_up(n_tok, tile) // tile < 2:
        tile = max(128, _round_up((n_tok + 1) // 2, 128))

    n_pad = _round_up(n_tok, tile)
    x2d = inp.reshape(n_tok, d_model)
    if n_pad != n_tok:
        x2d = jnp.pad(x2d, ((0, n_pad - n_tok), (0, 0)))

    cost = pl.CostEstimate(
        flops=4 * n_pad * d_model * d_inner,              # two matmuls
        transcendentals=n_pad * d_inner,                  # tanh in gelu
        bytes_accessed=(2 * n_pad * d_model * itemsize    # read x + write out
                        + 2 * d_model * d_inner * 2       # bf16 weights
                        + (d_inner + 3 * d_model) * 4),   # biases + LN params
    )

    kernel = _make_ffn_kernel(eps, gelu_bf16)

    def _run(single_buffer_params):
        est = _vmem_estimate(tile, d_model, d_inner, itemsize, single_buffer_params)
        vmem_limit = int(min(max(est + (8 << 20), 32 << 20), hard_cap))
        grid_spec = pltpu.PrefetchScalarGridSpec(
            num_scalar_prefetch=0,
            grid=(n_pad // tile,),
            in_specs=[
                pl.BlockSpec((tile, d_model), lambda i: (i, 0)),           # x tile (streamed)
                _param_spec((d_model, d_inner), single_buffer_params),     # W1 (bf16, resident)
                _param_spec((1, d_inner), single_buffer_params),           # b1
                _param_spec((d_inner, d_model), single_buffer_params),     # W2 (bf16, resident)
                _param_spec((1, d_model), single_buffer_params),           # b2
                _param_spec((1, d_model), single_buffer_params),           # gamma
                _param_spec((1, d_model), single_buffer_params),           # beta
            ],
            out_specs=pl.BlockSpec((tile, d_model), lambda i: (i, 0)),
        )
        return pl.pallas_call(
            kernel,
            out_shape=jax.ShapeDtypeStruct((n_pad, d_model), inp.dtype),
            grid_spec=grid_spec,
            compiler_params=pltpu.CompilerParams(
                dimension_semantics=("parallel",),
                vmem_limit_bytes=vmem_limit,
            ),
            cost_estimate=cost,
        )(x2d, params["w1"], params["b1"], params["w2"], params["b2"],
          params["gamma"], params["beta"])

    try:
        out2d = _run(True)
    except Exception:
        # pl.Buffered(1) not accepted on this jax build -> default buffering.
        out2d = _run(False)

    if n_pad != n_tok:
        out2d = out2d[:n_tok]
    return out2d.reshape(seq, bsz, d_model)


def _reference(inp, w1, b1, w2, b2, gamma, beta, eps=1e-12):
    x = inp.astype(jnp.float32)
    h = x @ w1 + b1
    h = h * 0.5 * (1.0 + jnp.tanh(_GELU_C * (h + 0.044715 * h ** 3)))
    y = h @ w2 + b2
    z = y + x
    mu = jnp.mean(z, -1, keepdims=True)
    var = jnp.mean((z - mu) ** 2, -1, keepdims=True)
    return ((z - mu) / jnp.sqrt(var + eps)) * gamma + beta


if __name__ == "__main__":
    # small, lane-dense config: d_model=128, d_inner=256, seq=12, batch=3
    seq, bsz, d_model, d_inner = 12, 3, 128, 256
    eps = 1e-12

    key = jax.random.PRNGKey(0)
    k_inp, k_w1, k_b1, k_w2, k_b2 = jax.random.split(key, 5)

    inp = jax.random.normal(k_inp, (seq, bsz, d_model), dtype=jnp.float32)
    # deterministic synthetic parameters (roughly nn.Linear-scale init)
    w1 = jax.random.normal(k_w1, (d_model, d_inner), dtype=jnp.float32) * 0.05
    b1 = jax.random.normal(k_b1, (d_inner,), dtype=jnp.float32) * 0.01
    w2 = jax.random.normal(k_w2, (d_inner, d_model), dtype=jnp.float32) * 0.05
    b2 = jax.random.normal(k_b2, (d_model,), dtype=jnp.float32) * 0.01
    gamma = jnp.ones((d_model,), dtype=jnp.float32)
    beta = jnp.zeros((d_model,), dtype=jnp.float32)

    # Cast / reshape parameters ONCE and reuse across calls (per perf review).
    params = prepare_xlnet_ffn_params(w1, b1, w2, b2, gamma, beta)

    out = xlnet_ffn(inp, params, eps=eps)
    out = jax.block_until_ready(out)
    assert out.shape == inp.shape and out.dtype == inp.dtype

    # bf16 matmul inputs + f32 accumulation vs. a pure-f32 reference:
    # output is O(1) after LayerNorm, so a bf16-appropriate tolerance is used.
    ref = _reference(inp, w1, b1, w2, b2, gamma, beta, eps=eps)
    assert jnp.allclose(out, ref, atol=3e-2, rtol=3e-2), "mismatch vs reference"

    # also exercise the multi-tile grid + tail-padding path
    seq2, bsz2 = 40, 7  # 280 tokens -> tm=128 -> padded to 384, grid of 3
    inp2 = jax.random.normal(jax.random.PRNGKey(1), (seq2, bsz2, d_model), dtype=jnp.float32)
    out2 = jax.block_until_ready(xlnet_ffn(inp2, params, eps=eps, tm=128))
    ref2 = _reference(inp2, w1, b1, w2, b2, gamma, beta, eps=eps)
    assert jnp.allclose(out2, ref2, atol=3e-2, rtol=3e-2), "mismatch vs reference (multi-tile)"

    print("KERNEL_OK")
</pallas_src>

<mosaic_0001>
module attributes {stable_mosaic.version = 11 : i64} {
  func.func @ffn_kernel(%arg0: i32, %arg1: memref<128x128xf32, #tpu.memory_space<vmem>>, %arg2: memref<128x256xbf16, #tpu.memory_space<vmem>>, %arg3: memref<1x256xf32, #tpu.memory_space<vmem>>, %arg4: memref<256x128xbf16, #tpu.memory_space<vmem>>, %arg5: memref<1x128xf32, #tpu.memory_space<vmem>>, %arg6: memref<1x128xf32, #tpu.memory_space<vmem>>, %arg7: memref<1x128xf32, #tpu.memory_space<vmem>>, %arg8: memref<128x128xf32, #tpu.memory_space<vmem>>) attributes {dimension_semantics = [#tpu.dimension_semantics<parallel>], iteration_bounds = array<i64: 1>, scalar_prefetch = 0 : i64, scratch_operands = 0 : i64, tpu.core_type = #tpu.core_type<tc>, window_params = [{transform_indices = @transform_0, window_bounds = array<i64: 128, 128>}, {pipeline_mode = #tpu.pipeline_mode<synchronous>, transform_indices = @transform_1, window_bounds = array<i64: 128, 256>}, {pipeline_mode = #tpu.pipeline_mode<synchronous>, transform_indices = @transform_2, window_bounds = array<i64: 1, 256>}, {pipeline_mode = #tpu.pipeline_mode<synchronous>, transform_indices = @transform_3, window_bounds = array<i64: 256, 128>}, {pipeline_mode = #tpu.pipeline_mode<synchronous>, transform_indices = @transform_4, window_bounds = array<i64: 1, 128>}, {pipeline_mode = #tpu.pipeline_mode<synchronous>, transform_indices = @transform_5, window_bounds = array<i64: 1, 128>}, {pipeline_mode = #tpu.pipeline_mode<synchronous>, transform_indices = @transform_6, window_bounds = array<i64: 1, 128>}, {transform_indices = @transform_7, window_bounds = array<i64: 128, 128>}]} {
    %c0 = arith.constant 0 : index
    %c0_0 = arith.constant 0 : index
    %0 = vector.load %arg1[%c0, %c0_0] : memref<128x128xf32, #tpu.memory_space<vmem>>, vector<128x128xf32>
    %c0_1 = arith.constant 0 : index
    %c0_2 = arith.constant 0 : index
    %1 = vector.load %arg1[%c0_1, %c0_2] : memref<128x128xf32, #tpu.memory_space<vmem>>, vector<128x128xf32>
    %2 = arith.truncf %1 : vector<128x128xf32> to vector<128x128xbf16>
    %c0_3 = arith.constant 0 : index
    %c0_4 = arith.constant 0 : index
    %3 = vector.load %arg2[%c0_3, %c0_4] : memref<128x256xbf16, #tpu.memory_space<vmem>>, vector<128x256xbf16>
    %cst = arith.constant dense<0.000000e+00> : vector<128x256xf32>
    %4 = tpu.matmul %2, %3, %cst {dimension_numbers = #tpu.dot_dimension_numbers<[1], [0], [0], [1], [0, 0, 1, 1], [], []>} : vector<128x128xbf16>, vector<128x256xbf16>, vector<128x256xf32> -> vector<128x256xf32>
    %c0_5 = arith.constant 0 : index
    %c0_6 = arith.constant 0 : index
    %5 = vector.load %arg3[%c0_5, %c0_6] : memref<1x256xf32, #tpu.memory_space<vmem>>, vector<1x256xf32>
    %6 = vector.broadcast %5 : vector<1x256xf32> to vector<128x256xf32>
    %7 = arith.addf %4, %6 : vector<128x256xf32>
    %8 = arith.mulf %7, %7 : vector<128x256xf32>
    %cst_7 = arith.constant 4.471500e-02 : f32
    %9 = vector.broadcast %cst_7 : f32 to vector<128x256xf32>
    %10 = arith.mulf %9, %8 : vector<128x256xf32>
    %cst_8 = arith.constant 1.000000e+00 : f32
    %11 = vector.broadcast %cst_8 : f32 to vector<128x256xf32>
    %12 = arith.addf %11, %10 : vector<128x256xf32>
    %13 = arith.mulf %7, %12 : vector<128x256xf32>
    %cst_9 = arith.constant 0.797884583 : f32
    %14 = vector.broadcast %cst_9 : f32 to vector<128x256xf32>
    %15 = arith.mulf %14, %13 : vector<128x256xf32>
    %16 = math.tanh %15 : vector<128x256xf32>
    %cst_10 = arith.constant 1.000000e+00 : f32
    %17 = vector.broadcast %cst_10 : f32 to vector<128x256xf32>
    %18 = arith.addf %17, %16 : vector<128x256xf32>
    %cst_11 = arith.constant 5.000000e-01 : f32
    %19 = vector.broadcast %cst_11 : f32 to vector<128x256xf32>
    %20 = arith.mulf %19, %18 : vector<128x256xf32>
    %21 = arith.mulf %7, %20 : vector<128x256xf32>
    %22 = arith.truncf %21 : vector<128x256xf32> to vector<128x256xbf16>
    %c0_12 = arith.constant 0 : index
    %c0_13 = arith.constant 0 : index
    %23 = vector.load %arg4[%c0_12, %c0_13] : memref<256x128xbf16, #tpu.memory_space<vmem>>, vector<256x128xbf16>
    %cst_14 = arith.constant dense<0.000000e+00> : vector<128x128xf32>
    %24 = tpu.matmul %22, %23, %cst_14 {dimension_numbers = #tpu.dot_dimension_numbers<[1], [0], [0], [1], [0, 0, 1, 1], [], []>} : vector<128x256xbf16>, vector<256x128xbf16>, vector<128x128xf32> -> vector<128x128xf32>
    %c0_15 = arith.constant 0 : index
    %c0_16 = arith.constant 0 : index
    %25 = vector.load %arg5[%c0_15, %c0_16] : memref<1x128xf32, #tpu.memory_space<vmem>>, vector<1x128xf32>
    %26 = vector.broadcast %25 : vector<1x128xf32> to vector<128x128xf32>
    %27 = arith.addf %24, %26 : vector<128x128xf32>
    %28 = arith.addf %27, %0 : vector<128x128xf32>
    %cst_17 = arith.constant dense<0.000000e+00> : vector<128xf32>
    %29 = vector.multi_reduction <add>, %28, %cst_17 [1] : vector<128x128xf32> to vector<128xf32>
    %30 = vector.shape_cast %29 : vector<128xf32> to vector<128x1xf32>
    %cst_18 = arith.constant 1.280000e+02 : f32
    %31 = vector.broadcast %cst_18 : f32 to vector<128x1xf32>
    %32 = arith.divf %30, %31 : vector<128x1xf32>
    %33 = vector.broadcast %32 : vector<128x1xf32> to vector<128x128xf32>
    %34 = arith.subf %28, %33 : vector<128x128xf32>
    %35 = arith.mulf %34, %34 : vector<128x128xf32>
    %cst_19 = arith.constant dense<0.000000e+00> : vector<128xf32>
    %36 = vector.multi_reduction <add>, %35, %cst_19 [1] : vector<128x128xf32> to vector<128xf32>
    %37 = vector.shape_cast %36 : vector<128xf32> to vector<128x1xf32>
    %cst_20 = arith.constant 1.280000e+02 : f32
    %38 = vector.broadcast %cst_20 : f32 to vector<128x1xf32>
    %39 = arith.divf %37, %38 : vector<128x1xf32>
    %cst_21 = arith.constant 9.99999996E-13 : f32
    %40 = vector.broadcast %cst_21 : f32 to vector<128x1xf32>
    %41 = arith.addf %39, %40 : vector<128x1xf32>
    %42 = math.rsqrt %41 : vector<128x1xf32>
    %43 = vector.broadcast %42 : vector<128x1xf32> to vector<128x128xf32>
    %44 = arith.mulf %34, %43 : vector<128x128xf32>
    %c0_22 = arith.constant 0 : index
    %c0_23 = arith.constant 0 : index
    %45 = vector.load %arg6[%c0_22, %c0_23] : memref<1x128xf32, #tpu.memory_space<vmem>>, vector<1x128xf32>
    %46 = vector.broadcast %45 : vector<1x128xf32> to vector<128x128xf32>
    %47 = arith.mulf %44, %46 : vector<128x128xf32>
    %c0_24 = arith.constant 0 : index
    %c0_25 = arith.constant 0 : index
    %48 = vector.load %arg7[%c0_24, %c0_25] : memref<1x128xf32, #tpu.memory_space<vmem>>, vector<1x128xf32>
    %49 = vector.broadcast %48 : vector<1x128xf32> to vector<128x128xf32>
    %50 = arith.addf %47, %49 : vector<128x128xf32>
    %c0_26 = arith.constant 0 : index
    %c0_27 = arith.constant 0 : index
    %51 = vector.load %arg8[%c0_26, %c0_27] : memref<128x128xf32, #tpu.memory_space<vmem>>, vector<128x128xf32>
    tpu.vector_store %arg8[%c0_26, %c0_27], %50 {strides = array<i32>} : memref<128x128xf32, #tpu.memory_space<vmem>>, vector<128x128xf32>,
    return
  }
  func.func @transform_0(%arg0: i32) -> (i32, i32) {
    %c0_i32 = arith.constant 0 : i32
    %c0_i32_0 = arith.constant 0 : i32
    return %arg0, %c0_i32 : i32, i32
  }
  func.func @transform_1(%arg0: i32) -> (i32, i32) {
    %c0_i32 = arith.constant 0 : i32
    %c0_i32_0 = arith.constant 0 : i32
    %c0_i32_1 = arith.constant 0 : i32
    return %c0_i32, %c0_i32_0 : i32, i32
  }
  func.func @transform_2(%arg0: i32) -> (i32, i32) {
    %c0_i32 = arith.constant 0 : i32
    %c0_i32_0 = arith.constant 0 : i32
    %c0_i32_1 = arith.constant 0 : i32
    return %c0_i32, %c0_i32_0 : i32, i32
  }
  func.func @transform_3(%arg0: i32) -> (i32, i32) {
    %c0_i32 = arith.constant 0 : i32
    %c0_i32_0 = arith.constant 0 : i32
    %c0_i32_1 = arith.constant 0 : i32
    return %c0_i32, %c0_i32_0 : i32, i32
  }
  func.func @transform_4(%arg0: i32) -> (i32, i32) {
    %c0_i32 = arith.constant 0 : i32
    %c0_i32_0 = arith.constant 0 : i32
    %c0_i32_1 = arith.constant 0 : i32
    return %c0_i32, %c0_i32_0 : i32, i32
  }
  func.func @transform_5(%arg0: i32) -> (i32, i32) {
    %c0_i32 = arith.constant 0 : i32
    %c0_i32_0 = arith.constant 0 : i32
    %c0_i32_1 = arith.constant 0 : i32
    return %c0_i32, %c0_i32_0 : i32, i32
  }
  func.func @transform_6(%arg0: i32) -> (i32, i32) {
    %c0_i32 = arith.constant 0 : i32
    %c0_i32_0 = arith.constant 0 : i32
    %c0_i32_1 = arith.constant 0 : i32
    return %c0_i32, %c0_i32_0 : i32, i32
  }
  func.func @transform_7(%arg0: i32) -> (i32, i32) {
    %c0_i32 = arith.constant 0 : i32
    %c0_i32_0 = arith.constant 0 : i32
    return %arg0, %c0_i32 : i32, i32
  }
}

module attributes {stable_mosaic.version = 11 : i64} {
  func.func @ffn_kernel(%arg0: i32, %arg1: memref<128x128xf32, #tpu.memory_space<vmem>>, %arg2: memref<128x256xbf16, #tpu.memory_space<vmem>>, %arg3: memref<1x256xf32, #tpu.memory_space<vmem>>, %arg4: memref<256x128xbf16, #tpu.memory_space<vmem>>, %arg5: memref<1x128xf32, #tpu.memory_space<vmem>>, %arg6: memref<1x128xf32, #tpu.memory_space<vmem>>, %arg7: memref<1x128xf32, #tpu.memory_space<vmem>>, %arg8: memref<128x128xf32, #tpu.memory_space<vmem>>) attributes {dimension_semantics = [#tpu.dimension_semantics<parallel>], iteration_bounds = array<i64: 1>, scalar_prefetch = 0 : i64, scratch_operands = 0 : i64, tpu.core_type = #tpu.core_type<tc>, window_params = [{transform_indices = @transform_0, window_bounds = array<i64: 128, 128>}, {pipeline_mode = #tpu.pipeline_mode<synchronous>, transform_indices = @transform_1, window_bounds = array<i64: 128, 256>}, {pipeline_mode = #tpu.pipeline_mode<synchronous>, transform_indices = @transform_2, window_bounds = array<i64: 1, 256>}, {pipeline_mode = #tpu.pipeline_mode<synchronous>, transform_indices = @transform_3, window_bounds = array<i64: 256, 128>}, {pipeline_mode = #tpu.pipeline_mode<synchronous>, transform_indices = @transform_4, window_bounds = array<i64: 1, 128>}, {pipeline_mode = #tpu.pipeline_mode<synchronous>, transform_indices = @transform_5, window_bounds = array<i64: 1, 128>}, {pipeline_mode = #tpu.pipeline_mode<synchronous>, transform_indices = @transform_6, window_bounds = array<i64: 1, 128>}, {transform_indices = @transform_7, window_bounds = array<i64: 128, 128>}]} {
    %c0 = arith.constant 0 : index
    %c0_0 = arith.constant 0 : index
    %0 = vector.load %arg1[%c0, %c0_0] : memref<128x128xf32, #tpu.memory_space<vmem>>, vector<128x128xf32>
    %c0_1 = arith.constant 0 : index
    %c0_2 = arith.constant 0 : index
    %1 = vector.load %arg1[%c0_1, %c0_2] : memref<128x128xf32, #tpu.memory_space<vmem>>, vector<128x128xf32>
    %2 = arith.truncf %1 : vector<128x128xf32> to vector<128x128xbf16>
    %c0_3 = arith.constant 0 : index
    %c0_4 = arith.constant 0 : index
    %3 = vector.load %arg2[%c0_3, %c0_4] : memref<128x256xbf16, #tpu.memory_space<vmem>>, vector<128x256xbf16>
    %cst = arith.constant dense<0.000000e+00> : vector<128x256xf32>
    %4 = tpu.matmul %2, %3, %cst {dimension_numbers = #tpu.dot_dimension_numbers<[1], [0], [0], [1], [0, 0, 1, 1], [], []>} : vector<128x128xbf16>, vector<128x256xbf16>, vector<128x256xf32> -> vector<128x256xf32>
    %c0_5 = arith.constant 0 : index
    %c0_6 = arith.constant 0 : index
    %5 = vector.load %arg3[%c0_5, %c0_6] : memref<1x256xf32, #tpu.memory_space<vmem>>, vector<1x256xf32>
    %6 = vector.broadcast %5 : vector<1x256xf32> to vector<128x256xf32>
    %7 = arith.addf %4, %6 : vector<128x256xf32>
    %8 = arith.mulf %7, %7 : vector<128x256xf32>
    %cst_7 = arith.constant 4.471500e-02 : f32
    %9 = vector.broadcast %cst_7 : f32 to vector<128x256xf32>
    %10 = arith.mulf %9, %8 : vector<128x256xf32>
    %cst_8 = arith.constant 1.000000e+00 : f32
    %11 = vector.broadcast %cst_8 : f32 to vector<128x256xf32>
    %12 = arith.addf %11, %10 : vector<128x256xf32>
    %13 = arith.mulf %7, %12 : vector<128x256xf32>
    %cst_9 = arith.constant 0.797884583 : f32
    %14 = vector.broadcast %cst_9 : f32 to vector<128x256xf32>
    %15 = arith.mulf %14, %13 : vector<128x256xf32>
    %16 = math.tanh %15 : vector<128x256xf32>
    %cst_10 = arith.constant 1.000000e+00 : f32
    %17 = vector.broadcast %cst_10 : f32 to vector<128x256xf32>
    %18 = arith.addf %17, %16 : vector<128x256xf32>
    %cst_11 = arith.constant 5.000000e-01 : f32
    %19 = vector.broadcast %cst_11 : f32 to vector<128x256xf32>
    %20 = arith.mulf %19, %18 : vector<128x256xf32>
    %21 = arith.mulf %7, %20 : vector<128x256xf32>
    %22 = arith.truncf %21 : vector<128x256xf32> to vector<128x256xbf16>
    %c0_12 = arith.constant 0 : index
    %c0_13 = arith.constant 0 : index
    %23 = vector.load %arg4[%c0_12, %c0_13] : memref<256x128xbf16, #tpu.memory_space<vmem>>, vector<256x128xbf16>
    %cst_14 = arith.constant dense<0.000000e+00> : vector<128x128xf32>
    %24 = tpu.matmul %22, %23, %cst_14 {dimension_numbers = #tpu.dot_dimension_numbers<[1], [0], [0], [1], [0, 0, 1, 1], [], []>} : vector<128x256xbf16>, vector<256x128xbf16>, vector<128x128xf32> -> vector<128x128xf32>
    %c0_15 = arith.constant 0 : index
    %c0_16 = arith.constant 0 : index
    %25 = vector.load %arg5[%c0_15, %c0_16] : memref<1x128xf32, #tpu.memory_space<vmem>>, vector<1x128xf32>
    %26 = vector.broadcast %25 : vector<1x128xf32> to vector<128x128xf32>
    %27 = arith.addf %24, %26 : vector<128x128xf32>
    %28 = arith.addf %27, %0 : vector<128x128xf32>
    %cst_17 = arith.constant dense<0.000000e+00> : vector<128xf32>
    %29 = vector.multi_reduction <add>, %28, %cst_17 [1] : vector<128x128xf32> to vector<128xf32>
    %30 = vector.shape_cast %29 : vector<128xf32> to vector<128x1xf32>
    %cst_18 = arith.constant 1.280000e+02 : f32
    %31 = vector.broadcast %cst_18 : f32 to vector<128x1xf32>
    %32 = arith.divf %30, %31 : vector<128x1xf32>
    %33 = vector.broadcast %32 : vector<128x1xf32> to vector<128x128xf32>
    %34 = arith.subf %28, %33 : vector<128x128xf32>
    %35 = arith.mulf %34, %34 : vector<128x128xf32>
    %cst_19 = arith.constant dense<0.000000e+00> : vector<128xf32>
    %36 = vector.multi_reduction <add>, %35, %cst_19 [1] : vector<128x128xf32> to vector<128xf32>
    %37 = vector.shape_cast %36 : vector<128xf32> to vector<128x1xf32>
    %cst_20 = arith.constant 1.280000e+02 : f32
    %38 = vector.broadcast %cst_20 : f32 to vector<128x1xf32>
    %39 = arith.divf %37, %38 : vector<128x1xf32>
    %cst_21 = arith.constant 9.99999996E-13 : f32
    %40 = vector.broadcast %cst_21 : f32 to vector<128x1xf32>
    %41 = arith.addf %39, %40 : vector<128x1xf32>
    %42 = math.rsqrt %41 : vector<128x1xf32>
    %43 = vector.broadcast %42 : vector<128x1xf32> to vector<128x128xf32>
    %44 = arith.mulf %34, %43 : vector<128x128xf32>
    %c0_22 = arith.constant 0 : index
    %c0_23 = arith.constant 0 : index
    %45 = vector.load %arg6[%c0_22, %c0_23] : memref<1x128xf32, #tpu.memory_space<vmem>>, vector<1x128xf32>
    %46 = vector.broadcast %45 : vector<1x128xf32> to vector<128x128xf32>
    %47 = arith.mulf %44, %46 : vector<128x128xf32>
    %c0_24 = arith.constant 0 : index
    %c0_25 = arith.constant 0 : index
    %48 = vector.load %arg7[%c0_24, %c0_25] : memref<1x128xf32, #tpu.memory_space<vmem>>, vector<1x128xf32>
    %49 = vector.broadcast %48 : vector<1x128xf32> to vector<128x128xf32>
    %50 = arith.addf %47, %49 : vector<128x128xf32>
    %c0_26 = arith.constant 0 : index
    %c0_27 = arith.constant 0 : index
    %51 = vector.load %arg8[%c0_26, %c0_27] : memref<128x128xf32, #tpu.memory_space<vmem>>, vector<128x128xf32>
    tpu.vector_store %arg8[%c0_26, %c0_27], %50 {strides = array<i32>} : memref<128x128xf32, #tpu.memory_space<vmem>>, vector<128x128xf32>,
    return
  }
  func.func @transform_0(%arg0: i32) -> (i32, i32) {
    %c0_i32 = arith.constant 0 : i32
    %c0_i32_0 = arith.constant 0 : i32
    return %arg0, %c0_i32 : i32, i32
  }
  func.func @transform_1(%arg0: i32) -> (i32, i32) {
    %c0_i32 = arith.constant 0 : i32
    %c0_i32_0 = arith.constant 0 : i32
    %c0_i32_1 = arith.constant 0 : i32
    return %c0_i32, %c0_i32_0 : i32, i32
  }
  func.func @transform_2(%arg0: i32) -> (i32, i32) {
    %c0_i32 = arith.constant 0 : i32
    %c0_i32_0 = arith.constant 0 : i32
    %c0_i32_1 = arith.constant 0 : i32
    return %c0_i32, %c0_i32_0 : i32, i32
  }
  func.func @transform_3(%arg0: i32) -> (i32, i32) {
    %c0_i32 = arith.constant 0 : i32
    %c0_i32_0 = arith.constant 0 : i32
    %c0_i32_1 = arith.constant 0 : i32
    return %c0_i32, %c0_i32_0 : i32, i32
  }
  func.func @transform_4(%arg0: i32) -> (i32, i32) {
    %c0_i32 = arith.constant 0 : i32
    %c0_i32_0 = arith.constant 0 : i32
    %c0_i32_1 = arith.constant 0 : i32
    return %c0_i32, %c0_i32_0 : i32, i32
  }
  func.func @transform_5(%arg0: i32) -> (i32, i32) {
    %c0_i32 = arith.constant 0 : i32
    %c0_i32_0 = arith.constant 0 : i32
    %c0_i32_1 = arith.constant 0 : i32
    return %c0_i32, %c0_i32_0 : i32, i32
  }
  func.func @transform_6(%arg0: i32) -> (i32, i32) {
    %c0_i32 = arith.constant 0 : i32
    %c0_i32_0 = arith.constant 0 : i32
    %c0_i32_1 = arith.constant 0 : i32
    return %c0_i32, %c0_i32_0 : i32, i32
  }
  func.func @transform_7(%arg0: i32) -> (i32, i32) {
    %c0_i32 = arith.constant 0 : i32
    %c0_i32_0 = arith.constant 0 : i32
    return %arg0, %c0_i32 : i32, i32
  }
}

</mosaic_0001>

<bundles_post_ra>
// kernel: tpu_custom_call.1
= control target key start
LH: loop header
LB: loop body
LE: loop exit
PB: predicated region body
PF: predicated region fallthrough
CT: control target
= control target key end

     0   :  { %12 = vsyncpa [#allocation3], 0  ;;  %s2105_s0 = inlined_call_operand.hbm [shape: f32[128,128], index: 0, kind: input, shape index: {}]   ;;  %s2106_s1 = inlined_call_operand.hbm [shape: bf16[128,256], index: 1, kind: input, shape index: {}]   ;;  %s2107_s2 = inlined_call_operand.vmem [shape: f32[1,256], index: 2, kind: input, shape index: {}]   ;;  %s2108_s3 = inlined_call_operand.hbm [shape: bf16[256,128], index: 3, kind: input, shape index: {}]   ;;  %s2109_s4 = inlined_call_operand.vmem [shape: f32[1,128], index: 4, kind: input, shape index: {}]   ;;  %s2110_s5 = inlined_call_operand.vmem [shape: f32[1,128], index: 5, kind: input, shape index: {}]   ;;  %s2111_s6 = inlined_call_operand.vmem [shape: f32[1,128], index: 6, kind: input, shape index: {}]   ;;  %s2112_s7 = inlined_call_operand.hbm [shape: f32[128,128], index: 7, kind: output, shape index: {}]  }
   0x1   :  { %13 = vsyncpa [#allocation6], 0 }
   0x2   :  { %14 = vsyncpa [#allocation4], 0  ;;  %s1474_s24 = smov [#allocation5]   ;;  %s1475_s26 = smov [#allocation2]  }
   0x3   :  { %s32_s25 = sshll.u32 %s1474_s24, 4  ;;  %s20_s27 = sshll.u32 %s1475_s26, 4  ;;  %s33_s25 = int_to_ptr.vmem [resolvable:$true] %s32_s25  ;;  %s1523_s27 = int_to_ptr.vmem [resolvable:$true] %s20_s27 }
   0x4   :  { %s1380_s30 = scalar_lea.hbm %s2106_s1, 2048 }
   0x5   :  { %p1381_p0 = scmp.ne.s32.totalorder %s2106_s1, %s1380_s30  ;;  %p1384_p1 = scmp.lt.u32.totalorder %s1380_s30, %s2106_s1 }
   0x7   :  { %p1386_p2 = pnand %p1384_p1, %p1381_p0 }
   0x9   :  { %1389 = shalt.err (!%p1386_p2)
}
   0xa   :  { %s1390_s12 = scalar_lea.vmem %s33_s25, 2048  ;;  %p1395_p4 = scmp.lt.s32.totalorder %s33_s25, %s33_s25 }
   0xb   :  { %p1391_p3 = scmp.ne.s32.totalorder %s33_s25, %s1390_s12  ;;  %p1396_p5 = scmp.lt.s32.totalorder %s1390_s12, %s1390_s12 }
   0xd   :  { %p1397_p6 = por %p1396_p5, %p1395_p4 }
   0xf   :  { %p1398_p7 = pnand %p1397_p6, %p1391_p3 }
  0x11   :  { %1401 = shalt.err (!%p1398_p7)
}
  0x12   :  { %s1476_s13 = smov 128   ;;  %s1477_s14 = smov 8  }
  0x13   :  { %38 = dma.hbm_to_vmem [thread:$0]  %s2106_s1, 2048, %s33_s25, [#allocation6], %s1476_s13, %s1476_s13, %s1477_s14  }
  0x14   :  { %s1402_s19 = scalar_lea.hbm %s2105_s0, 2048 }
  0x15   :  { %p1403_p8 = scmp.ne.s32.totalorder %s2105_s0, %s1402_s19  ;;  %p1406_p9 = scmp.lt.u32.totalorder %s1402_s19, %s2105_s0 }
  0x17   :  { %p1408_p10 = pnand %p1406_p9, %p1403_p8 }
  0x19   :  { %1411 = shalt.err (!%p1408_p10)
}
  0x1a   :  { %s1412_s24 = scalar_lea.vmem %s1523_s27, 2048  ;;  %p1417_p12 = scmp.lt.s32.totalorder %s1523_s27, %s1523_s27 }
  0x1b   :  { %p1413_p11 = scmp.ne.s32.totalorder %s1523_s27, %s1412_s24  ;;  %p1418_p13 = scmp.lt.s32.totalorder %s1412_s24, %s1412_s24 }
  0x1d   :  { %p1419_p0 = por %p1418_p13, %p1417_p12 }
  0x1f   :  { %p1420_p1 = pnand %p1419_p0, %p1413_p11 }
  0x21   :  { %1423 = shalt.err (!%p1420_p1)
}
  0x22   :  { %26 = dma.hbm_to_vmem [thread:$0]  %s2105_s0, 2048, %s1523_s27, [#allocation3], %s1476_s13, %s1476_s13, %s1477_s14  }
  0x23   :  { %s1478_s26 = smov [#allocation7]   ;;  %s1424_s8 = scalar_lea.hbm %s2108_s3, 2048 }
  0x24   :  { %s46_s28 = sshll.u32 %s1478_s26, 4  ;;  %p1425_p2 = scmp.ne.s32.totalorder %s2108_s3, %s1424_s8  ;;  %s47_s28 = int_to_ptr.vmem [resolvable:$true] %s46_s28 }
  0x25   :  { %p1428_p3 = scmp.lt.u32.totalorder %s1424_s8, %s2108_s3 }
  0x27   :  { %p1430_p4 = pnand %p1428_p3, %p1425_p2 }
  0x29   :  { %1433 = shalt.err (!%p1430_p4)
}
  0x2a   :  { %s1434_s15 = scalar_lea.vmem %s47_s28, 2048  ;;  %p1439_p6 = scmp.lt.s32.totalorder %s47_s28, %s47_s28 }
  0x2b   :  { %p1435_p5 = scmp.ne.s32.totalorder %s47_s28, %s1434_s15  ;;  %p1440_p7 = scmp.lt.s32.totalorder %s1434_s15, %s1434_s15 }
  0x2d   :  { %p1441_p8 = por %p1440_p7, %p1439_p6 }
  0x2f   :  { %p1442_p9 = pnand %p1441_p8, %p1435_p5 }
  0x31   :  { %1445 = shalt.err (!%p1442_p9)
}
  0x32   :  { %s1479_s0 = smov 64   ;;  %s1480_s27 = smov 4  }
  0x33   :  { %52 = dma.hbm_to_vmem [thread:$0]  %s2108_s3, 2048, %s47_s28, [#allocation6], %s1479_s0, %s1479_s0, %s1480_s27  }
  0x34   :  { %1468 = dma.done.wait [#allocation3], 2048  }
  0x35   :  { %1469 = vsyncadd [#allocation3], 4294965248 }
  0x36   :  { %1470 = dma.done.wait [#allocation6], 4096  }
  0x37   :  { %1471 = vsyncadd [#allocation6], 4294963200  ;;  %v1481_v0 = vmov 0   ;;  %v1231_v1 = vld [vmem:[#allocation5 + $0x4] ss:$8 sps:$4 sm:$0xff]   ;;  %v1580_v20 = vld [vmem:[#allocation2 + $0x10] sm:$0xff]  ;;  %v111_v57 = vlaneseq }
  0x38   :  { %233 = vmatprep.mubr.bf16.mxu0 %v1481_v0  ;;  %v1233_v2 = vld [vmem:[#allocation5] ss:$8 sps:$4 sm:$0xff]   ;;  %201 = vmatprep.subr.bf16.mxu0 %v1231_v1  ;;  %v1234_v3 = vld [vmem:[#allocation5 + $0x14] ss:$8 sps:$4 sm:$0xff]   ;;  %v1236_v4 = vld [vmem:[#allocation5 + $0x10] ss:$8 sps:$4 sm:$0xff]  }
  0x39   :  { %202 = vmatpush1.bf16.msra.mxu0 %v1233_v2  ;;  %v1237_v5 = vld [vmem:[#allocation5 + $0x24] ss:$8 sps:$4 sm:$0xff]   ;;  %v1239_v6 = vld [vmem:[#allocation5 + $0x20] ss:$8 sps:$4 sm:$0xff]   ;;  %v1240_v7 = vld [vmem:[#allocation5 + $0x34] ss:$8 sps:$4 sm:$0xff]  }
  0x3a   :  { %203 = vmatprep.subr.bf16.mxu0 %v1234_v3  ;;  %v1242_v8 = vld [vmem:[#allocation5 + $0x30] ss:$8 sps:$4 sm:$0xff]   ;;  %v1243_v9 = vld [vmem:[#allocation5 + $0x44] ss:$8 sps:$4 sm:$0xff]   ;;  %v1245_v10 = vld [vmem:[#allocation5 + $0x40] ss:$8 sps:$4 sm:$0xff]  }
  0x3b   :  { %v1246_v11 = vld [vmem:[#allocation5 + $0x54] ss:$8 sps:$4 sm:$0xff]   ;;  %v1248_v12 = vld [vmem:[#allocation5 + $0x50] ss:$8 sps:$4 sm:$0xff]   ;;  %v1249_v13 = vld [vmem:[#allocation5 + $0x64] ss:$8 sps:$4 sm:$0xff]  }
  0x3c   :  { %v1251_v14 = vld [vmem:[#allocation5 + $0x60] ss:$8 sps:$4 sm:$0xff]   ;;  %v1252_v15 = vld [vmem:[#allocation5 + $0x74] ss:$8 sps:$4 sm:$0xff]   ;;  %v1254_v16 = vld [vmem:[#allocation5 + $0x70] ss:$8 sps:$4 sm:$0xff]  }
  0x3d   :  { %204 = vmatpush1.bf16.msra.mxu0 %v1236_v4  ;;  %v1573_v17 = vld [vmem:[#allocation2] sm:$0xff]  ;;  %v1575_v18 = vld [vmem:[#allocation2 + $0x8] sm:$0xff]  ;;  %v72_v21 = vld [vmem:[#allocation2 + $0x18] sm:$0xff]  ;;  %v112_v58 = vshrl.u32 %v111_v57, 7 }
  0x3e   :  { %205 = vmatprep.subr.bf16.mxu0 %v1237_v5  ;;  %v85_v19 = vpack.c.bf16 %v1575_v18, %v1573_v17  ;;  %v86_v22 = vpack.c.bf16 %v72_v21, %v1580_v20  ;;  %v73_v23 = vld [vmem:[#allocation2 + $0x20] sm:$0xff]  ;;  %v74_v24 = vld [vmem:[#allocation2 + $0x28] sm:$0xff]  ;;  %v75_v26 = vld [vmem:[#allocation2 + $0x30] sm:$0xff] }
  0x3f   :  { %v87_v25 = vpack.c.bf16 %v74_v24, %v73_v23  ;;  %v76_v27 = vld [vmem:[#allocation2 + $0x38] sm:$0xff]  ;;  %v77_v29 = vld [vmem:[#allocation2 + $0x40] sm:$0xff]  ;;  %v78_v30 = vld [vmem:[#allocation2 + $0x48] sm:$0xff]  ;;  %v113_v59 = vsub.s32 0, %v112_v58  ;;  %v117_v61 = vsub.s32 1, %v112_v58 }
  0x40   :  { %v88_v28 = vpack.c.bf16 %v76_v27, %v75_v26  ;;  %v89_v31 = vpack.c.bf16 %v78_v30, %v77_v29  ;;  %v79_v32 = vld [vmem:[#allocation2 + $0x50] sm:$0xff]  ;;  %v80_v33 = vld [vmem:[#allocation2 + $0x58] sm:$0xff]  ;;  %v81_v35 = vld [vmem:[#allocation2 + $0x60] sm:$0xff] }
  0x41   :  { %206 = vmatpush1.bf16.msra.mxu0 %v1239_v6  ;;  %v90_v34 = vpack.c.bf16 %v80_v33, %v79_v32  ;;  %v82_v36 = vld [vmem:[#allocation2 + $0x68] sm:$0xff]  ;;  %v83_v38 = vld [vmem:[#allocation2 + $0x70] sm:$0xff]  ;;  %v84_v39 = vld [vmem:[#allocation2 + $0x78] sm:$0xff] }
  0x42   :  { %207 = vmatprep.subr.bf16.mxu0 %v1240_v7  ;;  %v91_v37 = vpack.c.bf16 %v82_v36, %v81_v35  ;;  %v92_v40 = vpack.c.bf16 %v84_v39, %v83_v38  ;;  %v1255_v41 = vld [vmem:[#allocation7 + $0x40] sm:$0xff]   ;;  %v1257_v43 = vld [vmem:[#allocation7 + $0x48] sm:$0xff]   ;;  %v1259_v45 = vld [vmem:[#allocation7 + $0x50] sm:$0xff]  }
  0x43   :  { %v1256_v42 = vld [vmem:[#allocation7] sm:$0xff]   ;;  %1158 = vmatprep.subr.bf16.mxu1 %v1255_v41  ;;  %v1258_v44 = vld [vmem:[#allocation7 + $0x8] sm:$0xff]   ;;  %v1260_v46 = vld [vmem:[#allocation7 + $0x10] sm:$0xff]  }
  0x44   :  { %1159 = vmatpush3.bf16.msra.mxu1 %v1256_v42  ;;  %v1261_v47 = vld [vmem:[#allocation7 + $0x58] sm:$0xff]   ;;  %v1263_v49 = vld [vmem:[#allocation7 + $0x60] sm:$0xff]   ;;  %v1265_v51 = vld [vmem:[#allocation7 + $0x68] sm:$0xff]  }
  0x45   :  { %208 = vmatpush1.bf16.msra.mxu0 %v1242_v8  ;;  %1160 = vmatprep.subr.bf16.mxu1 %v1257_v43  ;;  %v1262_v48 = vld [vmem:[#allocation7 + $0x18] sm:$0xff]   ;;  %v1264_v50 = vld [vmem:[#allocation7 + $0x20] sm:$0xff]   ;;  %v1266_v52 = vld [vmem:[#allocation7 + $0x28] sm:$0xff]  }
  0x46   :  { %209 = vmatprep.subr.bf16.mxu0 %v1243_v9  ;;  %v1267_v53 = vld [vmem:[#allocation7 + $0x70] sm:$0xff]   ;;  %v1269_v55 = vld [vmem:[#allocation7 + $0x78] sm:$0xff]   ;;  %v109_v60 = vld [vmem:[%s2107_s2] sm:$0x3] }
  0x47   :  { %v1268_v54 = vld [vmem:[#allocation7 + $0x30] sm:$0xff]   ;;  %v1270_v56 = vld [vmem:[#allocation7 + $0x38] sm:$0xff]   ;;  %v1592_v62 = vrot.slane %v109_v60, %v113_v59  ;;  %v1594_v63 = vrot.slane %v109_v60, %v117_v61 }
  0x48   :  { %1161 = vmatpush3.bf16.msra.mxu1 %v1258_v44 }
  0x49   :  { %210 = vmatpush1.bf16.msra.mxu0 %v1245_v10  ;;  %1162 = vmatprep.subr.bf16.mxu1 %v1259_v45 }
  0x4a   :  { %211 = vmatprep.subr.bf16.mxu0 %v1246_v11 }
  0x4c   :  { %1163 = vmatpush3.bf16.msra.mxu1 %v1260_v46 }
  0x4d   :  { %212 = vmatpush1.bf16.msra.mxu0 %v1248_v12  ;;  %1164 = vmatprep.subr.bf16.mxu1 %v1261_v47 }
  0x4e   :  { %213 = vmatprep.subr.bf16.mxu0 %v1249_v13 }
  0x50   :  { %1165 = vmatpush3.bf16.msra.mxu1 %v1262_v48 }
  0x51   :  { %214 = vmatpush1.bf16.msra.mxu0 %v1251_v14  ;;  %1166 = vmatprep.subr.bf16.mxu1 %v1263_v49 }
  0x52   :  { %215 = vmatprep.subr.bf16.mxu0 %v1252_v15 }
  0x54   :  { %1167 = vmatpush3.bf16.msra.mxu1 %v1264_v50 }
  0x55   :  { %216 = vmatpush1.bf16.msra.mxu0 %v1254_v16  ;;  %1168 = vmatprep.subr.bf16.mxu1 %v1265_v51 }
  0x58   :  { %234 = vmatmul.mubr.bf16.vlgmr.msra.gmra.mrb[0].mxu0 %v85_v19  ;;  %1169 = vmatpush3.bf16.msra.mxu1 %v1266_v52 }
  0x59   :  { %243 = vmatprep.mubr.bf16.mxu0 %v1481_v0  ;;  %1170 = vmatprep.subr.bf16.mxu1 %v1267_v53 }
  0x5c   :  { %1171 = vmatpush3.bf16.msra.mxu1 %v1268_v54 }
  0x5d   :  { %1172 = vmatprep.subr.bf16.mxu1 %v1269_v55 }
  0x60   :  { %244 = vmatmul.mubr.bf16.gmra.mrb[4].mxu0 %v86_v22  ;;  %1173 = vmatpush3.bf16.msra.mxu1 %v1270_v56 }
  0x61   :  { %253 = vmatprep.mubr.bf16.mxu0 %v1481_v0 }
  0x68   :  { %254 = vmatmul.mubr.bf16.gmra.mrb[8].mxu0 %v87_v25 }
  0x69   :  { %263 = vmatprep.mubr.bf16.mxu0 %v1481_v0 }
  0x70   :  { %264 = vmatmul.mubr.bf16.gmra.mrb[12].mxu0 %v88_v28 }
  0x71   :  { %273 = vmatprep.mubr.bf16.mxu0 %v1481_v0 }
  0x78   :  { %274 = vmatmul.mubr.bf16.gmra.mrb[16].mxu0 %v89_v31 }
  0x79   :  { %283 = vmatprep.mubr.bf16.mxu0 %v1481_v0 }
  0x80   :  { %284 = vmatmul.mubr.bf16.gmra.mrb[20].mxu0 %v90_v34 }
  0x81   :  { %293 = vmatprep.mubr.bf16.mxu0 %v1481_v0 }
  0x88   :  { %294 = vmatmul.mubr.bf16.gmra.mrb[24].mxu0 %v91_v37 }
  0x89   :  { %303 = vmatprep.mubr.bf16.mxu0 %v1481_v0 }
  0x90   :  { %304 = vmatmul.mubr.bf16.gmra.mrb[28].mxu0 %v92_v40 }
 0x12b   :  { %v235_v0 = vpop.f32.mrb[0].mxu0 }
 0x12c   :  { %v1597_v1 = vadd.f32 %v235_v0, %v1592_v62  ;;  %v237_v2 = vpop.f32.mrb[1].mxu0 }
 0x12d   :  { %v1600_v3 = vadd.f32 %v237_v2, %v1594_v63  ;;  %v239_v4 = vpop.f32.mrb[2].mxu0 }
 0x12e   :  { %v314_v5 = vmul.f32 %v1597_v1, %v1597_v1  ;;  %v1605_v6 = vadd.f32 %v239_v4, %v1592_v62  ;;  %v241_v7 = vpop.f32.mrb[3].mxu0 }
 0x12f   :  { %v315_v8 = vmul.f32 %v1600_v3, %v1600_v3  ;;  %v1610_v9 = vadd.f32 %v241_v7, %v1594_v63 }
 0x130   :  { %v346_v10 = vmul.f32 0.044715, %v314_v5  ;;  %v316_v11 = vmul.f32 %v1605_v6, %v1605_v6 }
 0x131   :  { %v347_v12 = vmul.f32 0.044715, %v315_v8  ;;  %v317_v13 = vmul.f32 %v1610_v9, %v1610_v9 }
 0x132   :  { %v378_v14 = vadd.f32 1.0, %v346_v10  ;;  %v348_v15 = vmul.f32 0.044715, %v316_v11 }
 0x133   :  { %v379_v16 = vadd.f32 1.0, %v347_v12  ;;  %v349_v19 = vmul.f32 0.044715, %v317_v13  ;;  %v245_v21 = vpop.f32.mrb[4].mxu0 }
 0x134   :  { %v410_v22 = vmul.f32 %v378_v14, %v1597_v1  ;;  %v380_v23 = vadd.f32 1.0, %v348_v15  ;;  %v1618_v24 = vadd.f32 %v245_v21, %v1592_v62  ;;  %v247_v25 = vpop.f32.mrb[5].mxu0 }
 0x135   :  { %v411_v26 = vmul.f32 %v379_v16, %v1600_v3  ;;  %v381_v27 = vadd.f32 1.0, %v349_v19  ;;  %v1622_v28 = vadd.f32 %v247_v25, %v1594_v63  ;;  %v249_v29 = vpop.f32.mrb[6].mxu0 }
 0x136   :  { %v442_v30 = vmul.f32 0.7978846, %v410_v22  ;;  %v412_v31 = vmul.f32 %v380_v23, %v1605_v6  ;;  %v318_v32 = vmul.f32 %v1618_v24, %v1618_v24  ;;  %v1628_v33 = vadd.f32 %v249_v29, %v1592_v62  ;;  %v251_v34 = vpop.f32.mrb[7].mxu0 }
 0x137   :  { %v443_v35 = vmul.f32 0.7978846, %v411_v26  ;;  %v413_v36 = vmul.f32 %v381_v27, %v1610_v9  ;;  %v319_v37 = vmul.f32 %v1622_v28, %v1622_v28  ;;  %v1634_v38 = vadd.f32 %v251_v34, %v1594_v63 }
 0x138   :  { %1271 = vtanh.f32 %v442_v30  ;;  %v444_v39 = vmul.f32 0.7978846, %v412_v31  ;;  %v350_v40 = vmul.f32 0.044715, %v318_v32  ;;  %v320_v41 = vmul.f32 %v1628_v33, %v1628_v33 }
 0x139   :  { %1273 = vtanh.f32 %v443_v35  ;;  %v445_v42 = vmul.f32 0.7978846, %v413_v36  ;;  %v351_v43 = vmul.f32 0.044715, %v319_v37  ;;  %v321_v44 = vmul.f32 %v1634_v38, %v1634_v38 }
 0x13a   :  { %1275 = vtanh.f32 %v444_v39  ;;  %v382_v45 = vadd.f32 1.0, %v350_v40  ;;  %v352_v46 = vmul.f32 0.044715, %v320_v41 }
 0x13b   :  { %v383_v47 = vadd.f32 1.0, %v351_v43  ;;  %v353_v48 = vmul.f32 0.044715, %v321_v44  ;;  %v255_v49 = vpop.f32.mrb[8].mxu0  ;;  %1277 = vtanh.f32 %v445_v42 }
 0x13c   :  { %v414_v50 = vmul.f32 %v382_v45, %v1618_v24  ;;  %v384_v51 = vadd.f32 1.0, %v352_v46  ;;  %v1642_v52 = vadd.f32 %v255_v49, %v1592_v62  ;;  %v257_v53 = vpop.f32.mrb[9].mxu0 }
 0x13d   :  { %v415_v54 = vmul.f32 %v383_v47, %v1622_v28  ;;  %v385_v55 = vadd.f32 1.0, %v353_v48  ;;  %v1646_v56 = vadd.f32 %v257_v53, %v1594_v63  ;;  %v259_v57 = vpop.f32.mrb[10].mxu0 }
 0x13e   :  { %v446_v58 = vmul.f32 0.7978846, %v414_v50  ;;  %v416_v59 = vmul.f32 %v384_v51, %v1628_v33  ;;  %v322_v60 = vmul.f32 %v1642_v52, %v1642_v52  ;;  %v1652_v61 = vadd.f32 %v259_v57, %v1592_v62  ;;  %v261_v0 = vpop.f32.mrb[11].mxu0 }
 0x13f   :  { %v447_v2 = vmul.f32 0.7978846, %v415_v54  ;;  %v417_v4 = vmul.f32 %v385_v55, %v1634_v38  ;;  %v323_v5 = vmul.f32 %v1646_v56, %v1646_v56  ;;  %v1658_v7 = vadd.f32 %v261_v0, %v1594_v63 }
 0x140   :  { %1279 = vtanh.f32 %v446_v58  ;;  %v448_v8 = vmul.f32 0.7978846, %v416_v59  ;;  %v354_v10 = vmul.f32 0.044715, %v322_v60  ;;  %v324_v11 = vmul.f32 %v1652_v61, %v1652_v61 }
 0x141   :  { %1281 = vtanh.f32 %v447_v2  ;;  %v449_v12 = vmul.f32 0.7978846, %v417_v4  ;;  %v355_v13 = vmul.f32 0.044715, %v323_v5  ;;  %v325_v14 = vmul.f32 %v1658_v7, %v1658_v7 }
 0x142   :  { %v1272_v15 = vpop.eup %1271  ;;  %1283 = vtanh.f32 %v448_v8  ;;  %v386_v16 = vadd.f32 1.0, %v354_v10  ;;  %v356_v19 = vmul.f32 0.044715, %v324_v11 }
 0x143   :  { %v1274_v21 = vpop.eup %1273  ;;  %v506_v22 = vadd.f32 1.0, %v1272_v15  ;;  %1285 = vtanh.f32 %v449_v12  ;;  %v387_v23 = vadd.f32 1.0, %v355_v13  ;;  %v357_v25 = vmul.f32 0.044715, %v325_v14  ;;  %v265_v26 = vpop.f32.mrb[12].mxu0 }
 0x144   :  { %v1276_v27 = vpop.eup %1275  ;;  %v418_v29 = vmul.f32 %v386_v16, %v1642_v52  ;;  %v388_v30 = vadd.f32 1.0, %v356_v19  ;;  %v1666_v31 = vadd.f32 %v265_v26, %v1592_v62  ;;  %v267_v32 = vpop.f32.mrb[13].mxu0  ;;  %v1668_v34 = vadd.f32 1.0, %v1274_v21 }
 0x145   :  { %v538_v35 = vmul.f32 0.5, %v506_v22  ;;  %v508_v36 = vadd.f32 1.0, %v1276_v27  ;;  %v419_v37 = vmul.f32 %v387_v23, %v1646_v56  ;;  %v389_v39 = vadd.f32 1.0, %v357_v25  ;;  %v269_v40 = vpop.f32.mrb[14].mxu0  ;;  %v1278_v46 = vpop.eup %1277 }
 0x146   :  { %v450_v41 = vmul.f32 0.7978846, %v418_v29  ;;  %v420_v42 = vmul.f32 %v388_v30, %v1652_v61  ;;  %v326_v43 = vmul.f32 %v1666_v31, %v1666_v31  ;;  %v1675_v44 = vadd.f32 %v267_v32, %v1594_v63  ;;  %v271_v45 = vpop.f32.mrb[15].mxu0 }
 0x147   :  { %v1678_v47 = vmul.f32 %v538_v35, %v1597_v1  ;;  %v540_v48 = vmul.f32 0.5, %v508_v36  ;;  %v451_v49 = vmul.f32 0.7978846, %v419_v37  ;;  %v421_v50 = vmul.f32 %v389_v39, %v1658_v7 }
 0x148   :  { %1287 = vtanh.f32 %v450_v41  ;;  %v452_v51 = vmul.f32 0.7978846, %v420_v42  ;;  %v358_v53 = vmul.f32 0.044715, %v326_v43  ;;  %v327_v54 = vmul.f32 %v1675_v44, %v1675_v44 }
 0x149   :  { %v1684_v55 = vmul.f32 %v540_v48, %v1605_v6  ;;  %1289 = vtanh.f32 %v451_v49  ;;  %v453_v57 = vmul.f32 0.7978846, %v421_v50  ;;  %v1687_v58 = vadd.f32 %v269_v40, %v1592_v62 }
 0x14a   :  { %v1280_v1 = vpop.eup %1279  ;;  %1291 = vtanh.f32 %v452_v51  ;;  %v390_v59 = vadd.f32 1.0, %v358_v53  ;;  %v359_v60 = vmul.f32 0.044715, %v327_v54  ;;  %v1690_v0 = vadd.f32 %v271_v45, %v1594_v63 }
 0x14b   :  { %v1282_v2 = vpop.eup %1281  ;;  %v510_v4 = vadd.f32 1.0, %v1280_v1  ;;  %1293 = vtanh.f32 %v453_v57  ;;  %v328_v5 = vmul.f32 %v1687_v58, %v1687_v58  ;;  %v275_v6 = vpop.f32.mrb[16].mxu0  ;;  %v1694_v8 = vadd.f32 1.0, %v1278_v46 }
 0x14c   :  { %v1284_v10 = vpop.eup %1283  ;;  %v511_v11 = vadd.f32 1.0, %v1282_v2  ;;  %v422_v12 = vmul.f32 %v390_v59, %v1666_v31  ;;  %v391_v13 = vadd.f32 1.0, %v359_v60  ;;  %v329_v14 = vmul.f32 %v1690_v0, %v1690_v0  ;;  %v277_v15 = vpop.f32.mrb[17].mxu0 }
 0x14d   :  { %v1286_v16 = vpop.eup %1285  ;;  %v542_v19 = vmul.f32 0.5, %v510_v4  ;;  %v512_v21 = vadd.f32 1.0, %v1284_v10  ;;  %v360_v22 = vmul.f32 0.044715, %v328_v5  ;;  %v1700_v23 = vadd.f32 %v275_v6, %v1592_v62  ;;  %v279_v25 = vpop.f32.mrb[18].mxu0 }
 0x14e   :  { %v543_v26 = vmul.f32 0.5, %v511_v11  ;;  %v513_v27 = vadd.f32 1.0, %v1286_v16  ;;  %v454_v29 = vmul.f32 0.7978846, %v422_v12  ;;  %v423_v30 = vmul.f32 %v391_v13, %v1675_v44  ;;  %v281_v32 = vpop.f32.mrb[19].mxu0 }
 0x14f   :  { %v1704_v35 = vmul.f32 %v542_v19, %v1618_v24  ;;  %v544_v36 = vmul.f32 0.5, %v512_v21  ;;  %v392_v37 = vadd.f32 1.0, %v360_v22  ;;  %v361_v39 = vmul.f32 0.044715, %v329_v14 }
 0x150   :  { %v1707_v40 = vmul.f32 %v543_v26, %v1622_v28  ;;  %v545_v41 = vmul.f32 0.5, %v513_v27  ;;  %1295 = vtanh.f32 %v454_v29  ;;  %v455_v42 = vmul.f32 0.7978846, %v423_v30 }
 0x151   :  { %v1710_v43 = vmul.f32 %v544_v36, %v1628_v33  ;;  %v424_v45 = vmul.f32 %v392_v37, %v1687_v58  ;;  %v393_v46 = vadd.f32 1.0, %v361_v39  ;;  %v330_v48 = vmul.f32 %v1700_v23, %v1700_v23 }
 0x152   :  { %v1288_v24 = vpop.eup %1287  ;;  %v1716_v49 = vmul.f32 %v545_v41, %v1634_v38  ;;  %1297 = vtanh.f32 %v455_v42  ;;  %v1719_v28 = vadd.f32 %v277_v15, %v1594_v63  ;;  %v1722_v50 = vadd.f32 %v279_v25, %v1592_v62 }
 0x153   :  { %v1290_v51 = vpop.eup %1289  ;;  %v514_v33 = vadd.f32 1.0, %v1288_v24  ;;  %v456_v53 = vmul.f32 0.7978846, %v424_v45  ;;  %v425_v54 = vmul.f32 %v393_v46, %v1690_v0  ;;  %v362_v57 = vmul.f32 0.044715, %v330_v48  ;;  %v285_v1 = vpop.f32.mrb[20].mxu0 }
 0x154   :  { %v1292_v59 = vpop.eup %1291  ;;  %v515_v60 = vadd.f32 1.0, %v1290_v51  ;;  %v331_v38 = vmul.f32 %v1719_v28, %v1719_v28  ;;  %v332_v2 = vmul.f32 %v1722_v50, %v1722_v50  ;;  %v1730_v4 = vadd.f32 %v281_v32, %v1594_v63  ;;  %v287_v5 = vpop.f32.mrb[21].mxu0 }
 0x155   :  { %v1294_v6 = vpop.eup %1293  ;;  %v546_v10 = vmul.f32 0.5, %v514_v33  ;;  %v516_v11 = vadd.f32 1.0, %v1292_v59  ;;  %1299 = vtanh.f32 %v456_v53  ;;  %v457_v12 = vmul.f32 0.7978846, %v425_v54  ;;  %v289_v13 = vpop.f32.mrb[22].mxu0 }
 0x156   :  { %v547_v14 = vmul.f32 0.5, %v515_v60  ;;  %v517_v15 = vadd.f32 1.0, %v1294_v6  ;;  %v394_v16 = vadd.f32 1.0, %v362_v57  ;;  %v363_v19 = vmul.f32 0.044715, %v331_v38  ;;  %v291_v21 = vpop.f32.mrb[23].mxu0 }
 0x157   :  { %v1733_v22 = vmul.f32 %v546_v10, %v1642_v52  ;;  %v548_v25 = vmul.f32 0.5, %v516_v11  ;;  %1301 = vtanh.f32 %v457_v12  ;;  %v364_v26 = vmul.f32 0.044715, %v332_v2 }
 0x158   :  { %v1736_v27 = vmul.f32 %v547_v14, %v1646_v56  ;;  %v549_v29 = vmul.f32 0.5, %v517_v15  ;;  %v426_v30 = vmul.f32 %v394_v16, %v1700_v23  ;;  %v395_v32 = vadd.f32 1.0, %v363_v19 }
 0x159   :  { %v1740_v36 = vmul.f32 %v548_v25, %v1652_v61  ;;  %v396_v37 = vadd.f32 1.0, %v364_v26  ;;  %v333_v39 = vmul.f32 %v1730_v4, %v1730_v4  ;;  %v539_v52 = vmul.f32 0.5, %v1668_v34 }
 0x15a   :  { %v1296_v41 = vpop.eup %1295  ;;  %v1746_v42 = vmul.f32 %v549_v29, %v1658_v7  ;;  %v458_v45 = vmul.f32 0.7978846, %v426_v30  ;;  %v427_v56 = vmul.f32 %v395_v32, %v1719_v28  ;;  %v541_v46 = vmul.f32 0.5, %v1694_v8 }
 0x15b   :  { %v518_v48 = vadd.f32 1.0, %v1296_v41  ;;  %v428_v24 = vmul.f32 %v396_v37, %v1722_v50  ;;  %v365_v61 = vmul.f32 0.044715, %v333_v39  ;;  %v571_v51 = vmul.f32 %v539_v52, %v1600_v3  ;;  %v295_v33 = vpop.f32.mrb[24].mxu0 }
 0x15c   :  { %v1298_v53 = vpop.eup %1297  ;;  %1303 = vtanh.f32 %v458_v45  ;;  %v459_v54 = vmul.f32 0.7978846, %v427_v56  ;;  %v573_v34 = vmul.f32 %v541_v46, %v1610_v9  ;;  %v602_v7 = vpack.c.bf16 %v1684_v55, %v1678_v47  ;;  %v297_v57 = vpop.f32.mrb[25].mxu0 }
 0x15d   :  { %v550_v59 = vmul.f32 0.5, %v518_v48  ;;  %v519_v60 = vadd.f32 1.0, %v1298_v53  ;;  %v460_v38 = vmul.f32 0.7978846, %v428_v24  ;;  %v397_v8 = vadd.f32 1.0, %v365_v61  ;;  %v299_v2 = vpop.f32.mrb[26].mxu0 }
 0x15e   :  { %1305 = vtanh.f32 %v459_v54  ;;  %v603_v6 = vpack.c.bf16 %v573_v34, %v571_v51  ;;  %v1756_v10 = vadd.f32 %v285_v1, %v1592_v62  ;;  %v1759_v3 = vadd.f32 %v287_v5, %v1594_v63  ;;  %v1761_v11 = vpop.f32.mrb[27].mxu0 }
 0x15f   :  { %v1300_v9 = vpop.eup %1299  ;;  %v1764_v12 = vmul.f32 %v550_v59, %v1666_v31  ;;  %v551_v47 = vmul.f32 0.5, %v519_v60  ;;  %1307 = vtanh.f32 %v460_v38  ;;  %v429_v55 = vmul.f32 %v397_v8, %v1730_v4 }
 0x160   :  { %v520_v14 = vadd.f32 1.0, %v1300_v9  ;;  %785 = vmatprep.mubr.bf16.mxu1 %v603_v6  ;;  %v334_v15 = vmul.f32 %v1756_v10, %v1756_v10  ;;  %v335_v1 = vmul.f32 %v1759_v3, %v1759_v3  ;;  %v1772_v5 = vadd.f32 %v289_v13, %v1592_v62 }
 0x161   :  { %v1302_v16 = vpop.eup %1301  ;;  %v1775_v19 = vmul.f32 %v551_v47, %v1675_v44  ;;  %v461_v31 = vmul.f32 0.7978846, %v429_v55  ;;  %786 = vmatmul.mubr.bf16.vlgmr.msra.gmra.mrb[0].mxu1 %v602_v7  ;;  %v1778_v25 = vadd.f32 %v291_v21, %v1594_v63  ;;  %v605_v26 = vpack.c.bf16 %v1716_v49, %v1707_v40 }
 0x162   :  { %v552_v29 = vmul.f32 0.5, %v520_v14  ;;  %v521_v30 = vadd.f32 1.0, %v1302_v16  ;;  %v366_v32 = vmul.f32 0.044715, %v334_v15  ;;  %v367_v37 = vmul.f32 0.044715, %v335_v1 }
 0x163   :  { %1309 = vtanh.f32 %v461_v31  ;;  %v336_v13 = vmul.f32 %v1772_v5, %v1772_v5  ;;  %v337_v44 = vmul.f32 %v1778_v25, %v1778_v25  ;;  %793 = vmatprep.mubr.bf16.mxu1 %v605_v26  ;;  %v604_v39 = vpack.c.bf16 %v1710_v43, %v1704_v35  ;;  %v305_v21 = vpop.f32.mrb[28].mxu0 }
 0x164   :  { %v1789_v52 = vmul.f32 %v552_v29, %v1687_v58  ;;  %v553_v40 = vmul.f32 0.5, %v521_v30  ;;  %v398_v49 = vadd.f32 1.0, %v366_v32  ;;  %v399_v41 = vadd.f32 1.0, %v367_v37  ;;  %v307_v45 = vpop.f32.mrb[29].mxu0 }
 0x165   :  { %v368_v56 = vmul.f32 0.044715, %v336_v13  ;;  %v369_v46 = vmul.f32 0.044715, %v337_v44  ;;  %v1792_v48 = vadd.f32 %v295_v33, %v1592_v62  ;;  %v1795_v24 = vadd.f32 %v297_v57, %v1594_v63  ;;  %v309_v61 = vpop.f32.mrb[30].mxu0 }
 0x166   :  { %v1304_v51 = vpop.eup %1303  ;;  %v1798_v35 = vmul.f32 %v553_v40, %v1690_v0  ;;  %v430_v58 = vmul.f32 %v398_v49, %v1756_v10  ;;  %v431_v43 = vmul.f32 %v399_v41, %v1759_v3  ;;  %v1803_v53 = vadd.f32 %v299_v2, %v1592_v62  ;;  %v311_v54 = vpop.f32.mrb[31].mxu0 }
 0x167   :  { %v522_v34 = vadd.f32 1.0, %v1304_v51  ;;  %v400_v7 = vadd.f32 1.0, %v368_v56  ;;  %v401_v33 = vadd.f32 1.0, %v369_v46  ;;  %v338_v57 = vmul.f32 %v1792_v48, %v1792_v48 }
 0x168   :  { %v1306_v59 = vpop.eup %1305  ;;  %v462_v60 = vmul.f32 0.7978846, %v430_v58  ;;  %v463_v38 = vmul.f32 0.7978846, %v431_v43  ;;  %v339_v0 = vmul.f32 %v1795_v24, %v1795_v24  ;;  %v340_v8 = vmul.f32 %v1803_v53, %v1803_v53 }
 0x169   :  { %v1308_v6 = vpop.eup %1307  ;;  %v554_v9 = vmul.f32 0.5, %v522_v34  ;;  %v523_v2 = vadd.f32 1.0, %v1306_v59  ;;  %v432_v47 = vmul.f32 %v400_v7, %v1772_v5  ;;  %v433_v55 = vmul.f32 %v401_v33, %v1778_v25  ;;  %794 = vmatmul.mubr.bf16.gmra.mrb[4].mxu1 %v604_v39 }
 0x16a   :  { %v524_v14 = vadd.f32 1.0, %v1308_v6  ;;  %1311 = vtanh.f32 %v462_v60  ;;  %v370_v15 = vmul.f32 0.044715, %v338_v57  ;;  %v371_v1 = vmul.f32 0.044715, %v339_v0 }
 0x16b   :  { %v1814_v16 = vmul.f32 %v554_v9, %v1700_v23  ;;  %v555_v31 = vmul.f32 0.5, %v523_v2  ;;  %1313 = vtanh.f32 %v463_v38  ;;  %v464_v26 = vmul.f32 0.7978846, %v432_v47 }
 0x16c   :  { %v556_v29 = vmul.f32 0.5, %v524_v14  ;;  %v465_v30 = vmul.f32 0.7978846, %v433_v55  ;;  %v402_v32 = vadd.f32 1.0, %v370_v15  ;;  %v403_v37 = vadd.f32 1.0, %v371_v1 }
 0x16d   :  { %v1310_v13 = vpop.eup %1309  ;;  %v1817_v44 = vmul.f32 %v555_v31, %v1719_v28  ;;  %1315 = vtanh.f32 %v464_v26  ;;  %v372_v39 = vmul.f32 0.044715, %v340_v8  ;;  %v1821_v40 = vadd.f32 %v1761_v11, %v1594_v63 }
 0x16e   :  { %v1824_v23 = vmul.f32 %v556_v29, %v1722_v50  ;;  %v525_v49 = vadd.f32 1.0, %v1310_v13  ;;  %1317 = vtanh.f32 %v465_v30  ;;  %v434_v41 = vmul.f32 %v402_v32, %v1792_v48 }
 0x16f   :  { %v435_v56 = vmul.f32 %v403_v37, %v1795_v24  ;;  %v404_v46 = vadd.f32 1.0, %v372_v39  ;;  %v341_v28 = vmul.f32 %v1821_v40, %v1821_v40  ;;  %v607_v51 = vpack.c.bf16 %v1746_v42, %v1736_v27 }
 0x170   :  { %v557_v58 = vmul.f32 0.5, %v525_v49  ;;  %v466_v43 = vmul.f32 0.7978846, %v434_v41  ;;  %v606_v11 = vpack.c.bf16 %v1740_v36, %v1733_v22  ;;  %v1835_v50 = vadd.f32 %v305_v21, %v1592_v62 }
 0x171   :  { %v467_v34 = vmul.f32 0.7978846, %v435_v56  ;;  %v436_v7 = vmul.f32 %v404_v46, %v1803_v53  ;;  %v373_v33 = vmul.f32 0.044715, %v341_v28  ;;  %801 = vmatprep.mubr.bf16.mxu1 %v607_v51  ;;  %v1839_v57 = vadd.f32 %v307_v45, %v1594_v63 }
 0x172   :  { %v589_v59 = vmul.f32 %v557_v58, %v1730_v4  ;;  %1319 = vtanh.f32 %v466_v43  ;;  %802 = vmatmul.mubr.bf16.gmra.mrb[8].mxu1 %v606_v11  ;;  %v342_v27 = vmul.f32 %v1835_v50, %v1835_v50  ;;  %v1845_v22 = vadd.f32 %v309_v61, %v1592_v62 }
 0x173   :  { %1321 = vtanh.f32 %v467_v34  ;;  %v468_v36 = vmul.f32 0.7978846, %v436_v7  ;;  %v405_v42 = vadd.f32 1.0, %v373_v33  ;;  %v343_v21 = vmul.f32 %v1839_v57, %v1839_v57 }
 0x174   :  { %v1312_v60 = vpop.eup %1311  ;;  %v374_v38 = vmul.f32 0.044715, %v342_v27  ;;  %v344_v45 = vmul.f32 %v1845_v22, %v1845_v22  ;;  %v1852_v4 = vadd.f32 %v311_v54, %v1594_v63  ;;  %v609_v0 = vpack.c.bf16 %v1798_v35, %v1775_v19 }
 0x175   :  { %v1314_v8 = vpop.eup %1313  ;;  %v526_v62 = vadd.f32 1.0, %v1312_v60  ;;  %1323 = vtanh.f32 %v468_v36  ;;  %v437_v61 = vmul.f32 %v405_v42, %v1821_v40  ;;  %v375_v6 = vmul.f32 0.044715, %v343_v21 }
 0x176   :  { %v527_v9 = vadd.f32 1.0, %v1314_v8  ;;  %v406_v2 = vadd.f32 1.0, %v374_v38  ;;  %v376_v47 = vmul.f32 0.044715, %v344_v45  ;;  %v345_v55 = vmul.f32 %v1852_v4, %v1852_v4  ;;  %809 = vmatprep.mubr.bf16.mxu1 %v609_v0 }
 0x177   :  { %v1316_v14 = vpop.eup %1315  ;;  %v558_v15 = vmul.f32 0.5, %v526_v62  ;;  %v469_v63 = vmul.f32 0.7978846, %v437_v61  ;;  %v407_v54 = vadd.f32 1.0, %v375_v6  ;;  %v608_v19 = vpack.c.bf16 %v1789_v52, %v1764_v12 }
 0x178   :  { %v1318_v35 = vpop.eup %1317  ;;  %v559_v1 = vmul.f32 0.5, %v527_v9  ;;  %v528_v31 = vadd.f32 1.0, %v1316_v14  ;;  %v438_v26 = vmul.f32 %v406_v2, %v1835_v50  ;;  %v408_v29 = vadd.f32 1.0, %v376_v47 }
 0x179   :  { %v590_v30 = vmul.f32 %v558_v15, %v1756_v10  ;;  %v529_v32 = vadd.f32 1.0, %v1318_v35  ;;  %1325 = vtanh.f32 %v469_v63  ;;  %v439_v37 = vmul.f32 %v407_v54, %v1839_v57 }
 0x17a   :  { %v591_v13 = vmul.f32 %v559_v1, %v1759_v3  ;;  %v560_v39 = vmul.f32 0.5, %v528_v31  ;;  %v470_v49 = vmul.f32 0.7978846, %v438_v26  ;;  %v440_v41 = vmul.f32 %v408_v29, %v1845_v22  ;;  %810 = vmatmul.mubr.bf16.gmra.mrb[12].mxu1 %v608_v19 }
 0x17b   :  { %v561_v12 = vmul.f32 0.5, %v529_v32  ;;  %v471_v52 = vmul.f32 0.7978846, %v439_v37  ;;  %v377_v56 = vmul.f32 0.044715, %v345_v55  ;;  %v611_v46 = vpack.c.bf16 %v589_v59, %v1817_v44 }
 0x17c   :  { %v1320_v28 = vpop.eup %1319  ;;  %v592_v51 = vmul.f32 %v560_v39, %v1772_v5  ;;  %1327 = vtanh.f32 %v470_v49  ;;  %v472_v10 = vmul.f32 0.7978846, %v440_v41  ;;  %v610_v58 = vpack.c.bf16 %v1824_v23, %v1814_v16 }
 0x17d   :  { %v1322_v43 = vpop.eup %1321  ;;  %v593_v3 = vmul.f32 %v561_v12, %v1778_v25  ;;  %v530_v11 = vadd.f32 1.0, %v1320_v28  ;;  %1329 = vtanh.f32 %v471_v52  ;;  %v409_v34 = vadd.f32 1.0, %v377_v56  ;;  %817 = vmatprep.mubr.bf16.mxu1 %v611_v46 }
 0x17e   :  { %1331 = vtanh.f32 %v472_v10  ;;  %v612_v7 = vpack.c.bf16 %v592_v51, %v590_v30  ;;  %v531_v5 = vadd.f32 1.0, %v1322_v43  ;;  %v1883_v30 = vld [vmem:[%s2109_s4] ss:$0 sm:$0xff] }
 0x17f   :  { %v1324_v33 = vpop.eup %1323  ;;  %v441_v44 = vmul.f32 %v409_v34, %v1852_v4  ;;  %v613_v59 = vpack.c.bf16 %v593_v3, %v591_v13  ;;  %v562_v27 = vmul.f32 0.5, %v530_v11  ;;  %v1367_v3 = vld [vmem:[#allocation2 + $0x18] sm:$0xff] }
 0x180   :  { %v532_v36 = vadd.f32 1.0, %v1324_v33  ;;  %v563_v23 = vmul.f32 0.5, %v531_v5 }
 0x181   :  { %v473_v42 = vmul.f32 0.7978846, %v441_v44  ;;  %v594_v25 = vmul.f32 %v562_v27, %v1792_v48  ;;  %v1368_v27 = vld [vmem:[#allocation2 + $0x20] sm:$0xff] }
 0x182   :  { %v564_v21 = vmul.f32 0.5, %v532_v36  ;;  %818 = vmatmul.mubr.bf16.gmra.mrb[16].mxu1 %v610_v58  ;;  %v595_v9 = vmul.f32 %v563_v23, %v1795_v24  ;;  %v1369_v36 = vld [vmem:[#allocation2 + $0x28] sm:$0xff] }
 0x183   :  { %v1326_v16 = vpop.eup %1325  ;;  %1333 = vtanh.f32 %v473_v42  ;;  %825 = vmatprep.mubr.bf16.mxu1 %v613_v59 }
 0x184   :  { %v596_v60 = vmul.f32 %v564_v21, %v1803_v53  ;;  %v533_v38 = vadd.f32 1.0, %v1326_v16 }
 0x186   :  { %v1328_v45 = vpop.eup %1327  ;;  %v565_v0 = vmul.f32 0.5, %v533_v38  ;;  %v614_v8 = vpack.c.bf16 %v596_v60, %v594_v25 }
 0x187   :  { %v1330_v62 = vpop.eup %1329  ;;  %v534_v61 = vadd.f32 1.0, %v1328_v45 }
 0x188   :  { %v1332_v6 = vpop.eup %1331  ;;  %v597_v2 = vmul.f32 %v565_v0, %v1821_v40  ;;  %v535_v14 = vadd.f32 1.0, %v1330_v62  ;;  %v1370_v0 = vld [vmem:[#allocation2 + $0x30] sm:$0xff] }
 0x189   :  { %v566_v47 = vmul.f32 0.5, %v534_v61  ;;  %v536_v55 = vadd.f32 1.0, %v1332_v6  ;;  %v1371_v61 = vld [vmem:[#allocation2 + $0x38] sm:$0xff] }
 0x18a   :  { %826 = vmatmul.mubr.bf16.gmra.mrb[20].mxu1 %v612_v7  ;;  %v615_v15 = vpack.c.bf16 %v597_v2, %v595_v9  ;;  %v567_v19 = vmul.f32 0.5, %v535_v14 }
 0x18b   :  { %v568_v48 = vmul.f32 0.5, %v536_v55  ;;  %v598_v53 = vmul.f32 %v566_v47, %v1835_v50 }
 0x18c   :  { %833 = vmatprep.mubr.bf16.mxu1 %v615_v15  ;;  %v599_v24 = vmul.f32 %v567_v19, %v1839_v57  ;;  %v1373_v19 = vld [vmem:[#allocation2 + $0x48] sm:$0xff] }
 0x18d   :  { %v1334_v63 = vpop.eup %1333  ;;  %v600_v54 = vmul.f32 %v568_v48, %v1845_v22 }
 0x18e   :  { %v537_v35 = vadd.f32 1.0, %v1334_v63  ;;  %v1372_v63 = vld [vmem:[#allocation2 + $0x40] sm:$0xff] }
 0x18f   :  { %v616_v1 = vpack.c.bf16 %v600_v54, %v598_v53 }
 0x190   :  { %v569_v31 = vmul.f32 0.5, %v537_v35 }
 0x192   :  { %v601_v40 = vmul.f32 %v569_v31, %v1852_v4  ;;  %834 = vmatmul.mubr.bf16.gmra.mrb[24].mxu1 %v614_v8 }
 0x194   :  { %v617_v26 = vpack.c.bf16 %v601_v40, %v599_v24 }
 0x196   :  { %841 = vmatprep.mubr.bf16.mxu1 %v617_v26 }
 0x19a   :  { %842 = vmatmul.mubr.bf16.gmra.mrb[28].mxu1 %v616_v1 }
 0x234   :  { %v1174_v29 = vpop.f32.mrb[0].mxu1 }
 0x235   :  { %v1175_v50 = vpop.f32.mrb[1].mxu1 }
 0x236   :  { %v1176_v22 = vadd.f32 %v1175_v50, %v1174_v29  ;;  %v1177_v32 = vpop.f32.mrb[2].mxu1 }
 0x237   :  { %v1178_v37 = vpop.f32.mrb[3].mxu1 }
 0x238   :  { %v788_v13 = vadd.f32 %v1176_v22, %v1883_v30  ;;  %v1179_v39 = vadd.f32 %v1178_v37, %v1177_v32  ;;  %v1374_v22 = vld [vmem:[#allocation2 + $0x50] sm:$0xff] }
 0x23a   :  { %v791_v57 = vadd.f32 %v1179_v39, %v1883_v30  ;;  %v1888_v4 = vadd.f32 %v788_v13, %v1573_v17  ;;  %v1375_v13 = vld [vmem:[#allocation2 + $0x58] sm:$0xff] }
 0x23c   :  { %v1180_v49 = vpop.f32.mrb[4].mxu1  ;;  %866 = vadd.xlane.f32.xlu0 %v1888_v4  ;;  %v1892_v56 = vadd.f32 %v791_v57, %v1575_v18 }
 0x23d   :  { %v1181_v41 = vpop.f32.mrb[5].mxu1 }
 0x23e   :  { %v1182_v12 = vadd.f32 %v1181_v41, %v1180_v49  ;;  %v1183_v52 = vpop.f32.mrb[6].mxu1 }
 0x23f   :  { %v1184_v46 = vpop.f32.mrb[7].mxu1 }
 0x240   :  { %v796_v28 = vadd.f32 %v1182_v12, %v1883_v30  ;;  %v1185_v51 = vadd.f32 %v1184_v46, %v1183_v52  ;;  %868 = vadd.xlane.f32.xlu0 %v1892_v56 }
 0x242   :  { %v799_v10 = vadd.f32 %v1185_v51, %v1883_v30  ;;  %v1898_v17 = vadd.f32 %v796_v28, %v1580_v20  ;;  %v1376_v51 = vld [vmem:[#allocation2 + $0x60] sm:$0xff] }
 0x244   :  { %870 = vadd.xlane.f32.xlu1 %v1898_v17  ;;  %v1901_v11 = vadd.f32 %v1367_v3, %v799_v10 }
 0x245   :  { %v1186_v58 = vpop.f32.mrb[8].mxu1 }
 0x246   :  { %v1187_v43 = vpop.f32.mrb[9].mxu1 }
 0x247   :  { %v1188_v18 = vadd.f32 %v1187_v43, %v1186_v58  ;;  %v1189_v34 = vpop.f32.mrb[10].mxu1  ;;  %v1377_v43 = vld [vmem:[#allocation2 + $0x68] sm:$0xff] }
 0x248   :  { %v1190_v7 = vpop.f32.mrb[11].mxu1  ;;  %872 = vadd.xlane.f32.xlu1 %v1901_v11 }
 0x249   :  { %v804_v33 = vadd.f32 %v1188_v18, %v1883_v30  ;;  %v1191_v44 = vadd.f32 %v1190_v7, %v1189_v34 }
 0x24b   :  { %v807_v59 = vadd.f32 %v1191_v44, %v1883_v30  ;;  %v1906_v20 = vadd.f32 %v1368_v27, %v804_v33 }
 0x24d   :  { %v1192_v5 = vpop.f32.mrb[12].mxu1  ;;  %874 = vadd.xlane.f32.xlu0 %v1906_v20  ;;  %v1909_v42 = vadd.f32 %v1369_v36, %v807_v59 }
 0x24e   :  { %v1193_v21 = vpop.f32.mrb[13].mxu1 }
 0x24f   :  { %v1194_v16 = vadd.f32 %v1193_v21, %v1192_v5  ;;  %v1195_v25 = vpop.f32.mrb[14].mxu1  ;;  %876 = vadd.xlane.f32.xlu1 %v1909_v42  ;;  %v1378_v5 = vld [vmem:[#allocation2 + $0x70] sm:$0xff]  ;;  %v1379_v21 = vld [vmem:[#allocation2 + $0x78] sm:$0xff] }
 0x250   :  { %v1196_v23 = vpop.f32.mrb[15].mxu1 }
 0x251   :  { %v812_v60 = vadd.f32 %v1194_v16, %v1883_v30  ;;  %v1197_v38 = vadd.f32 %v1196_v23, %v1195_v25 }
 0x253   :  { %v815_v45 = vadd.f32 %v1197_v38, %v1883_v30  ;;  %v1914_v8 = vadd.f32 %v1370_v0, %v812_v60 }
 0x255   :  { %v1198_v62 = vpop.f32.mrb[16].mxu1  ;;  %878 = vadd.xlane.f32.xlu0 %v1914_v8  ;;  %v1917_v6 = vadd.f32 %v1371_v61, %v815_v45 }
 0x256   :  { %v1199_v9 = vpop.f32.mrb[17].mxu1 }
 0x257   :  { %v1200_v2 = vadd.f32 %v1199_v9, %v1198_v62  ;;  %v1201_v47 = vpop.f32.mrb[18].mxu1  ;;  %880 = vadd.xlane.f32.xlu1 %v1917_v6 }
 0x258   :  { %v1202_v55 = vpop.f32.mrb[19].mxu1 }
 0x259   :  { %v820_v14 = vadd.f32 %v1200_v2, %v1883_v30  ;;  %v1203_v15 = vadd.f32 %v1202_v55, %v1201_v47 }
 0x25b   :  { %v823_v48 = vadd.f32 %v1203_v15, %v1883_v30  ;;  %v1922_v53 = vadd.f32 %v1372_v63, %v820_v14 }
 0x25d   :  { %v1204_v54 = vpop.f32.mrb[20].mxu1  ;;  %882 = vadd.xlane.f32.xlu0 %v1922_v53  ;;  %v1925_v35 = vadd.f32 %v1373_v19, %v823_v48 }
 0x25e   :  { %v1205_v1 = vpop.f32.mrb[21].mxu1 }
 0x25f   :  { %v1206_v31 = vadd.f32 %v1205_v1, %v1204_v54  ;;  %v1207_v24 = vpop.f32.mrb[22].mxu1  ;;  %884 = vadd.xlane.f32.xlu1 %v1925_v35 }
 0x260   :  { %v1208_v40 = vpop.f32.mrb[23].mxu1 }
 0x261   :  { %v828_v26 = vadd.f32 %v1206_v31, %v1883_v30  ;;  %v1209_v29 = vadd.f32 %v1208_v40, %v1207_v24 }
 0x263   :  { %v831_v50 = vadd.f32 %v1209_v29, %v1883_v30  ;;  %v1930_v32 = vadd.f32 %v1374_v22, %v828_v26 }
 0x265   :  { %v1210_v37 = vpop.f32.mrb[24].mxu1  ;;  %886 = vadd.xlane.f32.xlu0 %v1930_v32  ;;  %v1933_v39 = vadd.f32 %v1375_v13, %v831_v50 }
 0x266   :  { %v1211_v57 = vpop.f32.mrb[25].mxu1 }
 0x267   :  { %v1212_v49 = vadd.f32 %v1211_v57, %v1210_v37  ;;  %v1213_v41 = vpop.f32.mrb[26].mxu1  ;;  %888 = vadd.xlane.f32.xlu1 %v1933_v39 }
 0x268   :  { %v1214_v12 = vpop.f32.mrb[27].mxu1 }
 0x269   :  { %v836_v52 = vadd.f32 %v1212_v49, %v1883_v30  ;;  %v1215_v46 = vadd.f32 %v1214_v12, %v1213_v41 }
 0x26b   :  { %v839_v28 = vadd.f32 %v1215_v46, %v1883_v30  ;;  %v1938_v10 = vadd.f32 %v1376_v51, %v836_v52 }
 0x26d   :  { %v1216_v58 = vpop.f32.mrb[28].mxu1  ;;  %890 = vadd.xlane.f32.xlu0 %v1938_v10  ;;  %v1941_v3 = vadd.f32 %v1377_v43, %v839_v28 }
 0x26e   :  { %v1217_v18 = vpop.f32.mrb[29].mxu1 }
 0x26f   :  { %v1218_v34 = vadd.f32 %v1217_v18, %v1216_v58  ;;  %v1219_v7 = vpop.f32.mrb[30].mxu1  ;;  %892 = vadd.xlane.f32.xlu1 %v1941_v3 }
 0x270   :  { %v1220_v33 = vpop.f32.mrb[31].mxu1 }
 0x271   :  { %v844_v44 = vadd.f32 %v1218_v34, %v1883_v30  ;;  %v1221_v59 = vadd.f32 %v1220_v33, %v1219_v7 }
 0x273   :  { %v847_v27 = vadd.f32 %v1221_v59, %v1883_v30  ;;  %v1946_v36 = vadd.f32 %v1378_v5, %v844_v44 }
 0x275   :  { %894 = vadd.xlane.f32.xlu0 %v1946_v36  ;;  %v1949_v16 = vadd.f32 %v1379_v21, %v847_v27 }
 0x277   :  { %896 = vadd.xlane.f32.xlu1 %v1949_v16 }
 0x2c9   :  { %v867_v25 = vpop.xlane.xlu0 %866 }
 0x2ca   :  { %v899_v23 = vmul.f32 0.0078125, %v867_v25 }
 0x2cc   :  { %v1953_v60 = vsub.f32 %v1888_v4, %v899_v23 }
 0x2cd   :  { %v869_v38 = vpop.xlane.xlu0 %868 }
 0x2ce   :  { %v900_v45 = vmul.f32 0.0078125, %v869_v38  ;;  %v931_v30 = vmul.f32 %v1953_v60, %v1953_v60 }
 0x2d0   :  { %v1958_v0 = vsub.f32 %v1892_v56, %v900_v45  ;;  %947 = vadd.xlane.f32.xlu0 %v931_v30 }
 0x2d1   :  { %v871_v62 = vpop.xlane.xlu1 %870 }
 0x2d2   :  { %v901_v61 = vmul.f32 0.0078125, %v871_v62  ;;  %v932_v9 = vmul.f32 %v1958_v0, %v1958_v0 }
 0x2d4   :  { %v1963_v2 = vsub.f32 %v1898_v17, %v901_v61  ;;  %949 = vadd.xlane.f32.xlu1 %v932_v9 }
 0x2d5   :  { %v873_v4 = vpop.xlane.xlu1 %872 }
 0x2d6   :  { %v902_v47 = vmul.f32 0.0078125, %v873_v4  ;;  %v933_v55 = vmul.f32 %v1963_v2, %v1963_v2 }
 0x2d8   :  { %v1968_v14 = vsub.f32 %v1901_v11, %v902_v47  ;;  %951 = vadd.xlane.f32.xlu0 %v933_v55 }
 0x2da   :  { %v875_v56 = vpop.xlane.xlu0 %874  ;;  %v934_v15 = vmul.f32 %v1968_v14, %v1968_v14 }
 0x2db   :  { %v903_v48 = vmul.f32 0.0078125, %v875_v56 }
 0x2dc   :  { %v877_v63 = vpop.xlane.xlu1 %876  ;;  %953 = vadd.xlane.f32.xlu1 %v934_v15  ;;  %v2035_v15 = vld [vmem:[%s2110_s5] ss:$0 sm:$0xff]  ;;  %s1482_s5 = smov [#allocation8]  }
 0x2dd   :  { %v1973_v17 = vsub.f32 %v1906_v20, %v903_v48  ;;  %v904_v54 = vmul.f32 0.0078125, %v877_v63 }
 0x2df   :  { %v1976_v19 = vsub.f32 %v1909_v42, %v904_v54  ;;  %v935_v1 = vmul.f32 %v1973_v17, %v1973_v17  ;;  %v2041_v54 = vld [vmem:[%s2111_s6] ss:$0 sm:$0xff]  ;;  %s1110_s6 = sshll.u32 %s1482_s5, 4  ;;  %s1111_s6 = int_to_ptr.vmem [resolvable:$true] %s1110_s6 }
 0x2e0   :  { %s1446_s23 = scalar_lea.vmem %s1111_s6, 2048  ;;  %p1451_p11 = scmp.lt.s32.totalorder %s1111_s6, %s1111_s6 }
 0x2e1   :  { %955 = vadd.xlane.f32.xlu0 %v935_v1  ;;  %v936_v11 = vmul.f32 %v1976_v19, %v1976_v19  ;;  %p1447_p10 = scmp.ne.s32.totalorder %s1111_s6, %s1446_s23  ;;  %p1452_p12 = scmp.lt.s32.totalorder %s1446_s23, %s1446_s23 }
 0x2e2   :  { %v879_v31 = vpop.xlane.xlu0 %878 }
 0x2e3   :  { %v905_v24 = vmul.f32 0.0078125, %v879_v31  ;;  %957 = vadd.xlane.f32.xlu1 %v936_v11  ;;  %p1453_p13 = por %p1452_p12, %p1451_p11 }
 0x2e4   :  { %v881_v40 = vpop.xlane.xlu1 %880 }
 0x2e5   :  { %v1983_v26 = vsub.f32 %v1914_v8, %v905_v24  ;;  %v906_v20 = vmul.f32 0.0078125, %v881_v40  ;;  %p1454_p0 = pnand %p1453_p13, %p1447_p10 }
 0x2e7   :  { %v1986_v29 = vsub.f32 %v1917_v6, %v906_v20  ;;  %v937_v42 = vmul.f32 %v1983_v26, %v1983_v26 }
 0x2e9   :  { %959 = vadd.xlane.f32.xlu0 %v937_v42  ;;  %v938_v50 = vmul.f32 %v1986_v29, %v1986_v29 }
 0x2ea   :  { %v883_v22 = vpop.xlane.xlu0 %882 }
 0x2eb   :  { %v907_v37 = vmul.f32 0.0078125, %v883_v22  ;;  %961 = vadd.xlane.f32.xlu1 %v938_v50 }
 0x2ec   :  { %v885_v13 = vpop.xlane.xlu1 %884 }
 0x2ed   :  { %v1993_v57 = vsub.f32 %v1922_v53, %v907_v37  ;;  %v908_v8 = vmul.f32 0.0078125, %v885_v13 }
 0x2ef   :  { %v1996_v49 = vsub.f32 %v1925_v35, %v908_v8  ;;  %v939_v6 = vmul.f32 %v1993_v57, %v1993_v57 }
 0x2f1   :  { %963 = vadd.xlane.f32.xlu0 %v939_v6  ;;  %v940_v41 = vmul.f32 %v1996_v49, %v1996_v49 }
 0x2f2   :  { %v887_v12 = vpop.xlane.xlu0 %886 }
 0x2f3   :  { %v909_v52 = vmul.f32 0.0078125, %v887_v12  ;;  %965 = vadd.xlane.f32.xlu1 %v940_v41 }
 0x2f4   :  { %v889_v46 = vpop.xlane.xlu1 %888 }
 0x2f5   :  { %v2003_v28 = vsub.f32 %v1930_v32, %v909_v52  ;;  %v910_v53 = vmul.f32 0.0078125, %v889_v46 }
 0x2f7   :  { %v2006_v51 = vsub.f32 %v1933_v39, %v910_v53  ;;  %v941_v35 = vmul.f32 %v2003_v28, %v2003_v28 }
 0x2f9   :  { %967 = vadd.xlane.f32.xlu0 %v941_v35  ;;  %v942_v58 = vmul.f32 %v2006_v51, %v2006_v51 }
 0x2fa   :  { %v891_v43 = vpop.xlane.xlu0 %890 }
 0x2fb   :  { %v911_v18 = vmul.f32 0.0078125, %v891_v43  ;;  %969 = vadd.xlane.f32.xlu1 %v942_v58 }
 0x2fc   :  { %v893_v34 = vpop.xlane.xlu1 %892 }
 0x2fd   :  { %v2013_v7 = vsub.f32 %v1938_v10, %v911_v18  ;;  %v912_v32 = vmul.f32 0.0078125, %v893_v34 }
 0x2ff   :  { %v2016_v33 = vsub.f32 %v1941_v3, %v912_v32  ;;  %v943_v39 = vmul.f32 %v2013_v7, %v2013_v7 }
 0x301   :  { %971 = vadd.xlane.f32.xlu0 %v943_v39  ;;  %v944_v44 = vmul.f32 %v2016_v33, %v2016_v33 }
 0x302   :  { %v895_v59 = vpop.xlane.xlu0 %894 }
 0x303   :  { %v913_v27 = vmul.f32 0.0078125, %v895_v59  ;;  %973 = vadd.xlane.f32.xlu1 %v944_v44 }
 0x304   :  { %v897_v5 = vpop.xlane.xlu1 %896 }
 0x305   :  { %v2023_v21 = vsub.f32 %v1946_v36, %v913_v27  ;;  %v914_v10 = vmul.f32 0.0078125, %v897_v5 }
 0x307   :  { %v2026_v25 = vsub.f32 %v1949_v16, %v914_v10  ;;  %v945_v3 = vmul.f32 %v2023_v21, %v2023_v21 }
 0x309   :  { %975 = vadd.xlane.f32.xlu0 %v945_v3  ;;  %v946_v23 = vmul.f32 %v2026_v25, %v2026_v25 }
 0x30b   :  { %977 = vadd.xlane.f32.xlu1 %v946_v23 }
 0x35d   :  { %v948_v38 = vpop.xlane.xlu0 %947 }
 0x35e   :  { %v979_v45 = vmul.f32 0.0078125, %v948_v38 }
 0x360   :  { %v995_v30 = vadd.f32 1e-12, %v979_v45 }
 0x361   :  { %v950_v62 = vpop.xlane.xlu1 %949 }
 0x362   :  { %1335 = vrsqrt.f32 %v995_v30  ;;  %v980_v61 = vmul.f32 0.0078125, %v950_v62 }
 0x364   :  { %v996_v36 = vadd.f32 1e-12, %v980_v61 }
 0x365   :  { %v952_v9 = vpop.xlane.xlu0 %951 }
 0x366   :  { %1337 = vrsqrt.f32 %v996_v36  ;;  %v981_v4 = vmul.f32 0.0078125, %v952_v9 }
 0x368   :  { %v997_v16 = vadd.f32 1e-12, %v981_v4 }
 0x369   :  { %v954_v47 = vpop.xlane.xlu1 %953 }
 0x36a   :  { %1339 = vrsqrt.f32 %v997_v16  ;;  %v982_v55 = vmul.f32 0.0078125, %v954_v47 }
 0x36c   :  { %v1336_v56 = vpop.eup %1335  ;;  %v998_v48 = vadd.f32 1e-12, %v982_v55 }
 0x36d   :  { %v1027_v63 = vmul.f32 %v1336_v56, %v1953_v60 }
 0x36e   :  { %1341 = vrsqrt.f32 %v998_v48  ;;  %v956_v1 = vpop.xlane.xlu0 %955 }
 0x36f   :  { %v1050_v11 = vmul.f32 %v2035_v15, %v1027_v63  ;;  %v983_v31 = vmul.f32 0.0078125, %v956_v1 }
 0x370   :  { %v1338_v24 = vpop.eup %1337  ;;  %v958_v40 = vpop.xlane.xlu1 %957 }
 0x371   :  { %v1073_v20 = vadd.f32 %v2041_v54, %v1050_v11  ;;  %v1028_v42 = vmul.f32 %v1338_v24, %v1958_v0  ;;  %v999_v50 = vadd.f32 1e-12, %v983_v31  ;;  %v984_v22 = vmul.f32 0.0078125, %v958_v40 }
 0x373   :  { %1089 = vst [vmem:[#allocation8] sm:$0xff] %v1073_v20  ;;  %v1051_v60 = vmul.f32 %v2035_v15, %v1028_v42  ;;  %1343 = vrsqrt.f32 %v999_v50  ;;  %v1000_v37 = vadd.f32 1e-12, %v984_v22 }
 0x374   :  { %v1340_v13 = vpop.eup %1339 }
 0x375   :  { %v1074_v8 = vadd.f32 %v2041_v54, %v1051_v60  ;;  %v1029_v6 = vmul.f32 %v1340_v13, %v1963_v2  ;;  %1345 = vrsqrt.f32 %v1000_v37 }
 0x376   :  { %v960_v41 = vpop.xlane.xlu0 %959 }
 0x377   :  { %1090 = vst [vmem:[#allocation8 + $0x8] sm:$0xff] %v1074_v8  ;;  %v1052_v12 = vmul.f32 %v2035_v15, %v1029_v6  ;;  %v985_v52 = vmul.f32 0.0078125, %v960_v41 }
 0x378   :  { %v1342_v46 = vpop.eup %1341  ;;  %v962_v0 = vpop.xlane.xlu1 %961 }
 0x379   :  { %v1075_v53 = vadd.f32 %v2041_v54, %v1052_v12  ;;  %v1030_v35 = vmul.f32 %v1342_v46, %v1968_v14  ;;  %v1001_v58 = vadd.f32 1e-12, %v985_v52  ;;  %v986_v43 = vmul.f32 0.0078125, %v962_v0 }
 0x37b   :  { %1091 = vst [vmem:[#allocation8 + $0x10] sm:$0xff] %v1075_v53  ;;  %v1053_v18 = vmul.f32 %v2035_v15, %v1030_v35  ;;  %1347 = vrsqrt.f32 %v1001_v58  ;;  %v1002_v34 = vadd.f32 1e-12, %v986_v43 }
 0x37d   :  { %v1344_v2 = vpop.eup %1343  ;;  %v1076_v32 = vadd.f32 %v2041_v54, %v1053_v18  ;;  %1349 = vrsqrt.f32 %v1002_v34 }
 0x37e   :  { %v1031_v39 = vmul.f32 %v1344_v2, %v1973_v17  ;;  %v964_v44 = vpop.xlane.xlu0 %963 }
 0x37f   :  { %v1346_v59 = vpop.eup %1345  ;;  %1092 = vst [vmem:[#allocation8 + $0x18] sm:$0xff] %v1076_v32  ;;  %v987_v27 = vmul.f32 0.0078125, %v964_v44 }
 0x380   :  { %v1054_v5 = vmul.f32 %v2035_v15, %v1031_v39  ;;  %v1032_v14 = vmul.f32 %v1346_v59, %v1976_v19  ;;  %v966_v10 = vpop.xlane.xlu1 %965 }
 0x381   :  { %v1003_v3 = vadd.f32 1e-12, %v987_v27  ;;  %v988_v23 = vmul.f32 0.0078125, %v966_v10 }
 0x382   :  { %v1077_v38 = vadd.f32 %v2041_v54, %v1054_v5  ;;  %v1055_v45 = vmul.f32 %v2035_v15, %v1032_v14 }
 0x383   :  { %1351 = vrsqrt.f32 %v1003_v3  ;;  %v1004_v30 = vadd.f32 1e-12, %v988_v23 }
 0x384   :  { %1093 = vst [vmem:[#allocation8 + $0x20] sm:$0xff] %v1077_v38  ;;  %v1078_v17 = vadd.f32 %v2041_v54, %v1055_v45 }
 0x385   :  { %v1348_v62 = vpop.eup %1347  ;;  %1353 = vrsqrt.f32 %v1004_v30 }
 0x386   :  { %1094 = vst [vmem:[#allocation8 + $0x28] sm:$0xff] %v1078_v17  ;;  %v1033_v61 = vmul.f32 %v1348_v62, %v1983_v26  ;;  %v968_v36 = vpop.xlane.xlu0 %967 }
 0x387   :  { %v1350_v9 = vpop.eup %1349  ;;  %v989_v19 = vmul.f32 0.0078125, %v968_v36 }
 0x388   :  { %v1056_v4 = vmul.f32 %v2035_v15, %v1033_v61  ;;  %v1034_v16 = vmul.f32 %v1350_v9, %v1986_v29  ;;  %v970_v47 = vpop.xlane.xlu1 %969 }
 0x389   :  { %v1005_v55 = vadd.f32 1e-12, %v989_v19  ;;  %v990_v56 = vmul.f32 0.0078125, %v970_v47 }
 0x38a   :  { %v1079_v48 = vadd.f32 %v2041_v54, %v1056_v4  ;;  %v1057_v63 = vmul.f32 %v2035_v15, %v1034_v16 }
 0x38b   :  { %1355 = vrsqrt.f32 %v1005_v55  ;;  %v1006_v1 = vadd.f32 1e-12, %v990_v56 }
 0x38c   :  { %1095 = vst [vmem:[#allocation8 + $0x30] sm:$0xff] %v1079_v48  ;;  %v1080_v11 = vadd.f32 %v2041_v54, %v1057_v63 }
 0x38d   :  { %v1352_v26 = vpop.eup %1351  ;;  %1357 = vrsqrt.f32 %v1006_v1 }
 0x38e   :  { %1096 = vst [vmem:[#allocation8 + $0x38] sm:$0xff] %v1080_v11  ;;  %v1035_v31 = vmul.f32 %v1352_v26, %v1993_v57  ;;  %v972_v24 = vpop.xlane.xlu0 %971 }
 0x38f   :  { %v1354_v40 = vpop.eup %1353  ;;  %v991_v29 = vmul.f32 0.0078125, %v972_v24 }
 0x390   :  { %v1058_v20 = vmul.f32 %v2035_v15, %v1035_v31  ;;  %v1036_v42 = vmul.f32 %v1354_v40, %v1996_v49  ;;  %v974_v50 = vpop.xlane.xlu1 %973 }
 0x391   :  { %v1007_v22 = vadd.f32 1e-12, %v991_v29  ;;  %v992_v60 = vmul.f32 0.0078125, %v974_v50 }
 0x392   :  { %v1081_v37 = vadd.f32 %v2041_v54, %v1058_v20  ;;  %v1059_v13 = vmul.f32 %v2035_v15, %v1036_v42 }
 0x393   :  { %1359 = vrsqrt.f32 %v1007_v22  ;;  %v1008_v8 = vadd.f32 1e-12, %v992_v60 }
 0x394   :  { %1097 = vst [vmem:[#allocation8 + $0x40] sm:$0xff] %v1081_v37  ;;  %v1082_v6 = vadd.f32 %v2041_v54, %v1059_v13 }
 0x395   :  { %v1356_v57 = vpop.eup %1355  ;;  %1361 = vrsqrt.f32 %v1008_v8 }
 0x396   :  { %1098 = vst [vmem:[#allocation8 + $0x48] sm:$0xff] %v1082_v6  ;;  %v1037_v41 = vmul.f32 %v1356_v57, %v2003_v28  ;;  %v976_v12 = vpop.xlane.xlu0 %975 }
 0x397   :  { %v1358_v52 = vpop.eup %1357  ;;  %v993_v49 = vmul.f32 0.0078125, %v976_v12 }
 0x398   :  { %v1060_v46 = vmul.f32 %v2035_v15, %v1037_v41  ;;  %v1038_v0 = vmul.f32 %v1358_v52, %v2006_v51  ;;  %v978_v53 = vpop.xlane.xlu1 %977 }
 0x399   :  { %v1009_v35 = vadd.f32 1e-12, %v993_v49  ;;  %v994_v58 = vmul.f32 0.0078125, %v978_v53 }
 0x39a   :  { %v1083_v43 = vadd.f32 %v2041_v54, %v1060_v46  ;;  %v1061_v18 = vmul.f32 %v2035_v15, %v1038_v0 }
 0x39b   :  { %1363 = vrsqrt.f32 %v1009_v35  ;;  %v1010_v34 = vadd.f32 1e-12, %v994_v58 }
 0x39c   :  { %1099 = vst [vmem:[#allocation8 + $0x50] sm:$0xff] %v1083_v43  ;;  %v1084_v2 = vadd.f32 %v2041_v54, %v1061_v18 }
 0x39d   :  { %v1360_v28 = vpop.eup %1359  ;;  %1365 = vrsqrt.f32 %v1010_v34 }
 0x39e   :  { %1100 = vst [vmem:[#allocation8 + $0x58] sm:$0xff] %v1084_v2  ;;  %v1039_v32 = vmul.f32 %v1360_v28, %v2013_v7 }
 0x39f   :  { %v1362_v39 = vpop.eup %1361 }
 0x3a0   :  { %v1062_v51 = vmul.f32 %v2035_v15, %v1039_v32  ;;  %v1040_v44 = vmul.f32 %v1362_v39, %v2016_v33 }
 0x3a2   :  { %v1085_v59 = vadd.f32 %v2041_v54, %v1062_v51  ;;  %v1063_v27 = vmul.f32 %v2035_v15, %v1040_v44 }
 0x3a4   :  { %1101 = vst [vmem:[#allocation8 + $0x60] sm:$0xff] %v1085_v59  ;;  %v1086_v5 = vadd.f32 %v2041_v54, %v1063_v27 }
 0x3a5   :  { %v1364_v14 = vpop.eup %1363 }
 0x3a6   :  { %1102 = vst [vmem:[#allocation8 + $0x68] sm:$0xff] %v1086_v5  ;;  %v1041_v10 = vmul.f32 %v1364_v14, %v2023_v21 }
 0x3a7   :  { %v1366_v3 = vpop.eup %1365 }
 0x3a8   :  { %v1064_v23 = vmul.f32 %v2035_v15, %v1041_v10  ;;  %v1042_v7 = vmul.f32 %v1366_v3, %v2026_v25 }
 0x3aa   :  { %v1087_v33 = vadd.f32 %v2041_v54, %v1064_v23  ;;  %v1065_v38 = vmul.f32 %v2035_v15, %v1042_v7 }
 0x3ac   :  { %1103 = vst [vmem:[#allocation8 + $0x70] sm:$0xff] %v1087_v33  ;;  %v1088_v45 = vadd.f32 %v2041_v54, %v1065_v38 }
 0x3ae   :  { %1104 = vst [vmem:[#allocation8 + $0x78] sm:$0xff] %v1088_v45 }
 0x3af   :  { %1457 = shalt.err (!%p1454_p0)
}
 0x3b0   :  { %s1458_s25 = scalar_lea.hbm %s2112_s7, 2048 }
 0x3b1   :  { %p1459_p1 = scmp.ne.s32.totalorder %s2112_s7, %s1458_s25  ;;  %p1462_p2 = scmp.lt.u32.totalorder %s1458_s25, %s2112_s7 }
 0x3b3   :  { %p1464_p3 = pnand %p1462_p2, %p1459_p1 }
 0x3b5   :  { %1467 = shalt.err (!%p1464_p3)
}
 0x3b6   :  { %1116 = dma.vmem_to_hbm [thread:$0]  %s1111_s6, 2048, %s2112_s7, [#allocation4], %s1476_s13, %s1476_s13, %s1477_s14  }
 0x3b7   :  { %1472 = dma.done.wait [#allocation4], 2048  }
 0x3b8   :  { %1473 = vsyncadd [#allocation4], 4294965248 }
 0x3b9   :  { %1120 = vsyncpa [#allocation3], 1 }
 0x3ba   :  { %1121 = vsyncpa [#allocation6], 1 }
 0x3bb   :  { %1122 = vsyncpa [#allocation4], 1 }

// kernel: tpu_custom_call.1
= control target key start
LH: loop header
LB: loop body
LE: loop exit
PB: predicated region body
PF: predicated region fallthrough
CT: control target
= control target key end

     0   :  { %12 = vsyncpa [#allocation3], 0  ;;  %s2105_s0 = inlined_call_operand.hbm [shape: f32[128,128], index: 0, kind: input, shape index: {}]   ;;  %s2106_s1 = inlined_call_operand.hbm [shape: bf16[128,256], index: 1, kind: input, shape index: {}]   ;;  %s2107_s2 = inlined_call_operand.vmem [shape: f32[1,256], index: 2, kind: input, shape index: {}]   ;;  %s2108_s3 = inlined_call_operand.hbm [shape: bf16[256,128], index: 3, kind: input, shape index: {}]   ;;  %s2109_s4 = inlined_call_operand.vmem [shape: f32[1,128], index: 4, kind: input, shape index: {}]   ;;  %s2110_s5 = inlined_call_operand.vmem [shape: f32[1,128], index: 5, kind: input, shape index: {}]   ;;  %s2111_s6 = inlined_call_operand.vmem [shape: f32[1,128], index: 6, kind: input, shape index: {}]   ;;  %s2112_s7 = inlined_call_operand.hbm [shape: f32[128,128], index: 7, kind: output, shape index: {}]  }
   0x1   :  { %13 = vsyncpa [#allocation6], 0 }
   0x2   :  { %14 = vsyncpa [#allocation4], 0  ;;  %s1474_s24 = smov [#allocation5]   ;;  %s1475_s26 = smov [#allocation2]  }
   0x3   :  { %s32_s25 = sshll.u32 %s1474_s24, 4  ;;  %s20_s27 = sshll.u32 %s1475_s26, 4  ;;  %s33_s25 = int_to_ptr.vmem [resolvable:$true] %s32_s25  ;;  %s1523_s27 = int_to_ptr.vmem [resolvable:$true] %s20_s27 }
   0x4   :  { %s1380_s30 = scalar_lea.hbm %s2106_s1, 2048 }
   0x5   :  { %p1381_p0 = scmp.ne.s32.totalorder %s2106_s1, %s1380_s30  ;;  %p1384_p1 = scmp.lt.u32.totalorder %s1380_s30, %s2106_s1 }
   0x7   :  { %p1386_p2 = pnand %p1384_p1, %p1381_p0 }
   0x9   :  { %1389 = shalt.err (!%p1386_p2)
}
   0xa   :  { %s1390_s12 = scalar_lea.vmem %s33_s25, 2048  ;;  %p1395_p4 = scmp.lt.s32.totalorder %s33_s25, %s33_s25 }
   0xb   :  { %p1391_p3 = scmp.ne.s32.totalorder %s33_s25, %s1390_s12  ;;  %p1396_p5 = scmp.lt.s32.totalorder %s1390_s12, %s1390_s12 }
   0xd   :  { %p1397_p6 = por %p1396_p5, %p1395_p4 }
   0xf   :  { %p1398_p7 = pnand %p1397_p6, %p1391_p3 }
  0x11   :  { %1401 = shalt.err (!%p1398_p7)
}
  0x12   :  { %s1476_s13 = smov 128   ;;  %s1477_s14 = smov 8  }
  0x13   :  { %38 = dma.hbm_to_vmem [thread:$0]  %s2106_s1, 2048, %s33_s25, [#allocation6], %s1476_s13, %s1476_s13, %s1477_s14  }
  0x14   :  { %s1402_s19 = scalar_lea.hbm %s2105_s0, 2048 }
  0x15   :  { %p1403_p8 = scmp.ne.s32.totalorder %s2105_s0, %s1402_s19  ;;  %p1406_p9 = scmp.lt.u32.totalorder %s1402_s19, %s2105_s0 }
  0x17   :  { %p1408_p10 = pnand %p1406_p9, %p1403_p8 }
  0x19   :  { %1411 = shalt.err (!%p1408_p10)
}
  0x1a   :  { %s1412_s24 = scalar_lea.vmem %s1523_s27, 2048  ;;  %p1417_p12 = scmp.lt.s32.totalorder %s1523_s27, %s1523_s27 }
  0x1b   :  { %p1413_p11 = scmp.ne.s32.totalorder %s1523_s27, %s1412_s24  ;;  %p1418_p13 = scmp.lt.s32.totalorder %s1412_s24, %s1412_s24 }
  0x1d   :  { %p1419_p0 = por %p1418_p13, %p1417_p12 }
  0x1f   :  { %p1420_p1 = pnand %p1419_p0, %p1413_p11 }
  0x21   :  { %1423 = shalt.err (!%p1420_p1)
}
  0x22   :  { %26 = dma.hbm_to_vmem [thread:$0]  %s2105_s0, 2048, %s1523_s27, [#allocation3], %s1476_s13, %s1476_s13, %s1477_s14  }
  0x23   :  { %s1478_s26 = smov [#allocation7]   ;;  %s1424_s8 = scalar_lea.hbm %s2108_s3, 2048 }
  0x24   :  { %s46_s28 = sshll.u32 %s1478_s26, 4  ;;  %p1425_p2 = scmp.ne.s32.totalorder %s2108_s3, %s1424_s8  ;;  %s47_s28 = int_to_ptr.vmem [resolvable:$true] %s46_s28 }
  0x25   :  { %p1428_p3 = scmp.lt.u32.totalorder %s1424_s8, %s2108_s3 }
  0x27   :  { %p1430_p4 = pnand %p1428_p3, %p1425_p2 }
  0x29   :  { %1433 = shalt.err (!%p1430_p4)
}
  0x2a   :  { %s1434_s15 = scalar_lea.vmem %s47_s28, 2048  ;;  %p1439_p6 = scmp.lt.s32.totalorder %s47_s28, %s47_s28 }
  0x2b   :  { %p1435_p5 = scmp.ne.s32.totalorder %s47_s28, %s1434_s15  ;;  %p1440_p7 = scmp.lt.s32.totalorder %s1434_s15, %s1434_s15 }
  0x2d   :  { %p1441_p8 = por %p1440_p7, %p1439_p6 }
  0x2f   :  { %p1442_p9 = pnand %p1441_p8, %p1435_p5 }
  0x31   :  { %1445 = shalt.err (!%p1442_p9)
}
  0x32   :  { %s1479_s0 = smov 64   ;;  %s1480_s27 = smov 4  }
  0x33   :  { %52 = dma.hbm_to_vmem [thread:$0]  %s2108_s3, 2048, %s47_s28, [#allocation6], %s1479_s0, %s1479_s0, %s1480_s27  }
  0x34   :  { %1468 = dma.done.wait [#allocation3], 2048  }
  0x35   :  { %1469 = vsyncadd [#allocation3], 4294965248 }
  0x36   :  { %1470 = dma.done.wait [#allocation6], 4096  }
  0x37   :  { %1471 = vsyncadd [#allocation6], 4294963200  ;;  %v1481_v0 = vmov 0   ;;  %v1231_v1 = vld [vmem:[#allocation5 + $0x4] ss:$8 sps:$4 sm:$0xff]   ;;  %v1580_v20 = vld [vmem:[#allocation2 + $0x10] sm:$0xff]  ;;  %v111_v57 = vlaneseq }
  0x38   :  { %233 = vmatprep.mubr.bf16.mxu0 %v1481_v0  ;;  %v1233_v2 = vld [vmem:[#allocation5] ss:$8 sps:$4 sm:$0xff]   ;;  %201 = vmatprep.subr.bf16.mxu0 %v1231_v1  ;;  %v1234_v3 = vld [vmem:[#allocation5 + $0x14] ss:$8 sps:$4 sm:$0xff]   ;;  %v1236_v4 = vld [vmem:[#allocation5 + $0x10] ss:$8 sps:$4 sm:$0xff]  }
  0x39   :  { %202 = vmatpush1.bf16.msra.mxu0 %v1233_v2  ;;  %v1237_v5 = vld [vmem:[#allocation5 + $0x24] ss:$8 sps:$4 sm:$0xff]   ;;  %v1239_v6 = vld [vmem:[#allocation5 + $0x20] ss:$8 sps:$4 sm:$0xff]   ;;  %v1240_v7 = vld [vmem:[#allocation5 + $0x34] ss:$8 sps:$4 sm:$0xff]  }
  0x3a   :  { %203 = vmatprep.subr.bf16.mxu0 %v1234_v3  ;;  %v1242_v8 = vld [vmem:[#allocation5 + $0x30] ss:$8 sps:$4 sm:$0xff]   ;;  %v1243_v9 = vld [vmem:[#allocation5 + $0x44] ss:$8 sps:$4 sm:$0xff]   ;;  %v1245_v10 = vld [vmem:[#allocation5 + $0x40] ss:$8 sps:$4 sm:$0xff]  }
  0x3b   :  { %v1246_v11 = vld [vmem:[#allocation5 + $0x54] ss:$8 sps:$4 sm:$0xff]   ;;  %v1248_v12 = vld [vmem:[#allocation5 + $0x50] ss:$8 sps:$4 sm:$0xff]   ;;  %v1249_v13 = vld [vmem:[#allocation5 + $0x64] ss:$8 sps:$4 sm:$0xff]  }
  0x3c   :  { %v1251_v14 = vld [vmem:[#allocation5 + $0x60] ss:$8 sps:$4 sm:$0xff]   ;;  %v1252_v15 = vld [vmem:[#allocation5 + $0x74] ss:$8 sps:$4 sm:$0xff]   ;;  %v1254_v16 = vld [vmem:[#allocation5 + $0x70] ss:$8 sps:$4 sm:$0xff]  }
  0x3d   :  { %204 = vmatpush1.bf16.msra.mxu0 %v1236_v4  ;;  %v1573_v17 = vld [vmem:[#allocation2] sm:$0xff]  ;;  %v1575_v18 = vld [vmem:[#allocation2 + $0x8] sm:$0xff]  ;;  %v72_v21 = vld [vmem:[#allocation2 + $0x18] sm:$0xff]  ;;  %v112_v58 = vshrl.u32 %v111_v57, 7 }
  0x3e   :  { %205 = vmatprep.subr.bf16.mxu0 %v1237_v5  ;;  %v85_v19 = vpack.c.bf16 %v1575_v18, %v1573_v17  ;;  %v86_v22 = vpack.c.bf16 %v72_v21, %v1580_v20  ;;  %v73_v23 = vld [vmem:[#allocation2 + $0x20] sm:$0xff]  ;;  %v74_v24 = vld [vmem:[#allocation2 + $0x28] sm:$0xff]  ;;  %v75_v26 = vld [vmem:[#allocation2 + $0x30] sm:$0xff] }
  0x3f   :  { %v87_v25 = vpack.c.bf16 %v74_v24, %v73_v23  ;;  %v76_v27 = vld [vmem:[#allocation2 + $0x38] sm:$0xff]  ;;  %v77_v29 = vld [vmem:[#allocation2 + $0x40] sm:$0xff]  ;;  %v78_v30 = vld [vmem:[#allocation2 + $0x48] sm:$0xff]  ;;  %v113_v59 = vsub.s32 0, %v112_v58  ;;  %v117_v61 = vsub.s32 1, %v112_v58 }
  0x40   :  { %v88_v28 = vpack.c.bf16 %v76_v27, %v75_v26  ;;  %v89_v31 = vpack.c.bf16 %v78_v30, %v77_v29  ;;  %v79_v32 = vld [vmem:[#allocation2 + $0x50] sm:$0xff]  ;;  %v80_v33 = vld [vmem:[#allocation2 + $0x58] sm:$0xff]  ;;  %v81_v35 = vld [vmem:[#allocation2 + $0x60] sm:$0xff] }
  0x41   :  { %206 = vmatpush1.bf16.msra.mxu0 %v1239_v6  ;;  %v90_v34 = vpack.c.bf16 %v80_v33, %v79_v32  ;;  %v82_v36 = vld [vmem:[#allocation2 + $0x68] sm:$0xff]  ;;  %v83_v38 = vld [vmem:[#allocation2 + $0x70] sm:$0xff]  ;;  %v84_v39 = vld [vmem:[#allocation2 + $0x78] sm:$0xff] }
  0x42   :  { %207 = vmatprep.subr.bf16.mxu0 %v1240_v7  ;;  %v91_v37 = vpack.c.bf16 %v82_v36, %v81_v35  ;;  %v92_v40 = vpack.c.bf16 %v84_v39, %v83_v38  ;;  %v1255_v41 = vld [vmem:[#allocation7 + $0x40] sm:$0xff]   ;;  %v1257_v43 = vld [vmem:[#allocation7 + $0x48] sm:$0xff]   ;;  %v1259_v45 = vld [vmem:[#allocation7 + $0x50] sm:$0xff]  }
  0x43   :  { %v1256_v42 = vld [vmem:[#allocation7] sm:$0xff]   ;;  %1158 = vmatprep.subr.bf16.mxu1 %v1255_v41  ;;  %v1258_v44 = vld [vmem:[#allocation7 + $0x8] sm:$0xff]   ;;  %v1260_v46 = vld [vmem:[#allocation7 + $0x10] sm:$0xff]  }
  0x44   :  { %1159 = vmatpush3.bf16.msra.mxu1 %v1256_v42  ;;  %v1261_v47 = vld [vmem:[#allocation7 + $0x58] sm:$0xff]   ;;  %v1263_v49 = vld [vmem:[#allocation7 + $0x60] sm:$0xff]   ;;  %v1265_v51 = vld [vmem:[#allocation7 + $0x68] sm:$0xff]  }
  0x45   :  { %208 = vmatpush1.bf16.msra.mxu0 %v1242_v8  ;;  %1160 = vmatprep.subr.bf16.mxu1 %v1257_v43  ;;  %v1262_v48 = vld [vmem:[#allocation7 + $0x18] sm:$0xff]   ;;  %v1264_v50 = vld [vmem:[#allocation7 + $0x20] sm:$0xff]   ;;  %v1266_v52 = vld [vmem:[#allocation7 + $0x28] sm:$0xff]  }
  0x46   :  { %209 = vmatprep.subr.bf16.mxu0 %v1243_v9  ;;  %v1267_v53 = vld [vmem:[#allocation7 + $0x70] sm:$0xff]   ;;  %v1269_v55 = vld [vmem:[#allocation7 + $0x78] sm:$0xff]   ;;  %v109_v60 = vld [vmem:[%s2107_s2] sm:$0x3] }
  0x47   :  { %v1268_v54 = vld [vmem:[#allocation7 + $0x30] sm:$0xff]   ;;  %v1270_v56 = vld [vmem:[#allocation7 + $0x38] sm:$0xff]   ;;  %v1592_v62 = vrot.slane %v109_v60, %v113_v59  ;;  %v1594_v63 = vrot.slane %v109_v60, %v117_v61 }
  0x48   :  { %1161 = vmatpush3.bf16.msra.mxu1 %v1258_v44 }
  0x49   :  { %210 = vmatpush1.bf16.msra.mxu0 %v1245_v10  ;;  %1162 = vmatprep.subr.bf16.mxu1 %v1259_v45 }
  0x4a   :  { %211 = vmatprep.subr.bf16.mxu0 %v1246_v11 }
  0x4c   :  { %1163 = vmatpush3.bf16.msra.mxu1 %v1260_v46 }
  0x4d   :  { %212 = vmatpush1.bf16.msra.mxu0 %v1248_v12  ;;  %1164 = vmatprep.subr.bf16.mxu1 %v1261_v47 }
  0x4e   :  { %213 = vmatprep.subr.bf16.mxu0 %v1249_v13 }
  0x50   :  { %1165 = vmatpush3.bf16.msra.mxu1 %v1262_v48 }
  0x51   :  { %214 = vmatpush1.bf16.msra.mxu0 %v1251_v14  ;;  %1166 = vmatprep.subr.bf16.mxu1 %v1263_v49 }
  0x52   :  { %215 = vmatprep.subr.bf16.mxu0 %v1252_v15 }
  0x54   :  { %1167 = vmatpush3.bf16.msra.mxu1 %v1264_v50 }
  0x55   :  { %216 = vmatpush1.bf16.msra.mxu0 %v1254_v16  ;;  %1168 = vmatprep.subr.bf16.mxu1 %v1265_v51 }
  0x58   :  { %234 = vmatmul.mubr.bf16.vlgmr.msra.gmra.mrb[0].mxu0 %v85_v19  ;;  %1169 = vmatpush3.bf16.msra.mxu1 %v1266_v52 }
  0x59   :  { %243 = vmatprep.mubr.bf16.mxu0 %v1481_v0  ;;  %1170 = vmatprep.subr.bf16.mxu1 %v1267_v53 }
  0x5c   :  { %1171 = vmatpush3.bf16.msra.mxu1 %v1268_v54 }
  0x5d   :  { %1172 = vmatprep.subr.bf16.mxu1 %v1269_v55 }
  0x60   :  { %244 = vmatmul.mubr.bf16.gmra.mrb[4].mxu0 %v86_v22  ;;  %1173 = vmatpush3.bf16.msra.mxu1 %v1270_v56 }
  0x61   :  { %253 = vmatprep.mubr.bf16.mxu0 %v1481_v0 }
  0x68   :  { %254 = vmatmul.mubr.bf16.gmra.mrb[8].mxu0 %v87_v25 }
  0x69   :  { %263 = vmatprep.mubr.bf16.mxu0 %v1481_v0 }
  0x70   :  { %264 = vmatmul.mubr.bf16.gmra.mrb[12].mxu0 %v88_v28 }
  0x71   :  { %273 = vmatprep.mubr.bf16.mxu0 %v1481_v0 }
  0x78   :  { %274 = vmatmul.mubr.bf16.gmra.mrb[16].mxu0 %v89_v31 }
  0x79   :  { %283 = vmatprep.mubr.bf16.mxu0 %v1481_v0 }
  0x80   :  { %284 = vmatmul.mubr.bf16.gmra.mrb[20].mxu0 %v90_v34 }
  0x81   :  { %293 = vmatprep.mubr.bf16.mxu0 %v1481_v0 }
  0x88   :  { %294 = vmatmul.mubr.bf16.gmra.mrb[24].mxu0 %v91_v37 }
  0x89   :  { %303 = vmatprep.mubr.bf16.mxu0 %v1481_v0 }
  0x90   :  { %304 = vmatmul.mubr.bf16.gmra.mrb[28].mxu0 %v92_v40 }
 0x12b   :  { %v235_v0 = vpop.f32.mrb[0].mxu0 }
 0x12c   :  { %v1597_v1 = vadd.f32 %v235_v0, %v1592_v62  ;;  %v237_v2 = vpop.f32.mrb[1].mxu0 }
 0x12d   :  { %v1600_v3 = vadd.f32 %v237_v2, %v1594_v63  ;;  %v239_v4 = vpop.f32.mrb[2].mxu0 }
 0x12e   :  { %v314_v5 = vmul.f32 %v1597_v1, %v1597_v1  ;;  %v1605_v6 = vadd.f32 %v239_v4, %v1592_v62  ;;  %v241_v7 = vpop.f32.mrb[3].mxu0 }
 0x12f   :  { %v315_v8 = vmul.f32 %v1600_v3, %v1600_v3  ;;  %v1610_v9 = vadd.f32 %v241_v7, %v1594_v63 }
 0x130   :  { %v346_v10 = vmul.f32 0.044715, %v314_v5  ;;  %v316_v11 = vmul.f32 %v1605_v6, %v1605_v6 }
 0x131   :  { %v347_v12 = vmul.f32 0.044715, %v315_v8  ;;  %v317_v13 = vmul.f32 %v1610_v9, %v1610_v9 }
 0x132   :  { %v378_v14 = vadd.f32 1.0, %v346_v10  ;;  %v348_v15 = vmul.f32 0.044715, %v316_v11 }
 0x133   :  { %v379_v16 = vadd.f32 1.0, %v347_v12  ;;  %v349_v19 = vmul.f32 0.044715, %v317_v13  ;;  %v245_v21 = vpop.f32.mrb[4].mxu0 }
 0x134   :  { %v410_v22 = vmul.f32 %v378_v14, %v1597_v1  ;;  %v380_v23 = vadd.f32 1.0, %v348_v15  ;;  %v1618_v24 = vadd.f32 %v245_v21, %v1592_v62  ;;  %v247_v25 = vpop.f32.mrb[5].mxu0 }
 0x135   :  { %v411_v26 = vmul.f32 %v379_v16, %v1600_v3  ;;  %v381_v27 = vadd.f32 1.0, %v349_v19  ;;  %v1622_v28 = vadd.f32 %v247_v25, %v1594_v63  ;;  %v249_v29 = vpop.f32.mrb[6].mxu0 }
 0x136   :  { %v442_v30 = vmul.f32 0.7978846, %v410_v22  ;;  %v412_v31 = vmul.f32 %v380_v23, %v1605_v6  ;;  %v318_v32 = vmul.f32 %v1618_v24, %v1618_v24  ;;  %v1628_v33 = vadd.f32 %v249_v29, %v1592_v62  ;;  %v251_v34 = vpop.f32.mrb[7].mxu0 }
 0x137   :  { %v443_v35 = vmul.f32 0.7978846, %v411_v26  ;;  %v413_v36 = vmul.f32 %v381_v27, %v1610_v9  ;;  %v319_v37 = vmul.f32 %v1622_v28, %v1622_v28  ;;  %v1634_v38 = vadd.f32 %v251_v34, %v1594_v63 }
 0x138   :  { %1271 = vtanh.f32 %v442_v30  ;;  %v444_v39 = vmul.f32 0.7978846, %v412_v31  ;;  %v350_v40 = vmul.f32 0.044715, %v318_v32  ;;  %v320_v41 = vmul.f32 %v1628_v33, %v1628_v33 }
 0x139   :  { %1273 = vtanh.f32 %v443_v35  ;;  %v445_v42 = vmul.f32 0.7978846, %v413_v36  ;;  %v351_v43 = vmul.f32 0.044715, %v319_v37  ;;  %v321_v44 = vmul.f32 %v1634_v38, %v1634_v38 }
 0x13a   :  { %1275 = vtanh.f32 %v444_v39  ;;  %v382_v45 = vadd.f32 1.0, %v350_v40  ;;  %v352_v46 = vmul.f32 0.044715, %v320_v41 }
 0x13b   :  { %v383_v47 = vadd.f32 1.0, %v351_v43  ;;  %v353_v48 = vmul.f32 0.044715, %v321_v44  ;;  %v255_v49 = vpop.f32.mrb[8].mxu0  ;;  %1277 = vtanh.f32 %v445_v42 }
 0x13c   :  { %v414_v50 = vmul.f32 %v382_v45, %v1618_v24  ;;  %v384_v51 = vadd.f32 1.0, %v352_v46  ;;  %v1642_v52 = vadd.f32 %v255_v49, %v1592_v62  ;;  %v257_v53 = vpop.f32.mrb[9].mxu0 }
 0x13d   :  { %v415_v54 = vmul.f32 %v383_v47, %v1622_v28  ;;  %v385_v55 = vadd.f32 1.0, %v353_v48  ;;  %v1646_v56 = vadd.f32 %v257_v53, %v1594_v63  ;;  %v259_v57 = vpop.f32.mrb[10].mxu0 }
 0x13e   :  { %v446_v58 = vmul.f32 0.7978846, %v414_v50  ;;  %v416_v59 = vmul.f32 %v384_v51, %v1628_v33  ;;  %v322_v60 = vmul.f32 %v1642_v52, %v1642_v52  ;;  %v1652_v61 = vadd.f32 %v259_v57, %v1592_v62  ;;  %v261_v0 = vpop.f32.mrb[11].mxu0 }
 0x13f   :  { %v447_v2 = vmul.f32 0.7978846, %v415_v54  ;;  %v417_v4 = vmul.f32 %v385_v55, %v1634_v38  ;;  %v323_v5 = vmul.f32 %v1646_v56, %v1646_v56  ;;  %v1658_v7 = vadd.f32 %v261_v0, %v1594_v63 }
 0x140   :  { %1279 = vtanh.f32 %v446_v58  ;;  %v448_v8 = vmul.f32 0.7978846, %v416_v59  ;;  %v354_v10 = vmul.f32 0.044715, %v322_v60  ;;  %v324_v11 = vmul.f32 %v1652_v61, %v1652_v61 }
 0x141   :  { %1281 = vtanh.f32 %v447_v2  ;;  %v449_v12 = vmul.f32 0.7978846, %v417_v4  ;;  %v355_v13 = vmul.f32 0.044715, %v323_v5  ;;  %v325_v14 = vmul.f32 %v1658_v7, %v1658_v7 }
 0x142   :  { %v1272_v15 = vpop.eup %1271  ;;  %1283 = vtanh.f32 %v448_v8  ;;  %v386_v16 = vadd.f32 1.0, %v354_v10  ;;  %v356_v19 = vmul.f32 0.044715, %v324_v11 }
 0x143   :  { %v1274_v21 = vpop.eup %1273  ;;  %v506_v22 = vadd.f32 1.0, %v1272_v15  ;;  %1285 = vtanh.f32 %v449_v12  ;;  %v387_v23 = vadd.f32 1.0, %v355_v13  ;;  %v357_v25 = vmul.f32 0.044715, %v325_v14  ;;  %v265_v26 = vpop.f32.mrb[12].mxu0 }
 0x144   :  { %v1276_v27 = vpop.eup %1275  ;;  %v418_v29 = vmul.f32 %v386_v16, %v1642_v52  ;;  %v388_v30 = vadd.f32 1.0, %v356_v19  ;;  %v1666_v31 = vadd.f32 %v265_v26, %v1592_v62  ;;  %v267_v32 = vpop.f32.mrb[13].mxu0  ;;  %v1668_v34 = vadd.f32 1.0, %v1274_v21 }
 0x145   :  { %v538_v35 = vmul.f32 0.5, %v506_v22  ;;  %v508_v36 = vadd.f32 1.0, %v1276_v27  ;;  %v419_v37 = vmul.f32 %v387_v23, %v1646_v56  ;;  %v389_v39 = vadd.f32 1.0, %v357_v25  ;;  %v269_v40 = vpop.f32.mrb[14].mxu0  ;;  %v1278_v46 = vpop.eup %1277 }
 0x146   :  { %v450_v41 = vmul.f32 0.7978846, %v418_v29  ;;  %v420_v42 = vmul.f32 %v388_v30, %v1652_v61  ;;  %v326_v43 = vmul.f32 %v1666_v31, %v1666_v31  ;;  %v1675_v44 = vadd.f32 %v267_v32, %v1594_v63  ;;  %v271_v45 = vpop.f32.mrb[15].mxu0 }
 0x147   :  { %v1678_v47 = vmul.f32 %v538_v35, %v1597_v1  ;;  %v540_v48 = vmul.f32 0.5, %v508_v36  ;;  %v451_v49 = vmul.f32 0.7978846, %v419_v37  ;;  %v421_v50 = vmul.f32 %v389_v39, %v1658_v7 }
 0x148   :  { %1287 = vtanh.f32 %v450_v41  ;;  %v452_v51 = vmul.f32 0.7978846, %v420_v42  ;;  %v358_v53 = vmul.f32 0.044715, %v326_v43  ;;  %v327_v54 = vmul.f32 %v1675_v44, %v1675_v44 }
 0x149   :  { %v1684_v55 = vmul.f32 %v540_v48, %v1605_v6  ;;  %1289 = vtanh.f32 %v451_v49  ;;  %v453_v57 = vmul.f32 0.7978846, %v421_v50  ;;  %v1687_v58 = vadd.f32 %v269_v40, %v1592_v62 }
 0x14a   :  { %v1280_v1 = vpop.eup %1279  ;;  %1291 = vtanh.f32 %v452_v51  ;;  %v390_v59 = vadd.f32 1.0, %v358_v53  ;;  %v359_v60 = vmul.f32 0.044715, %v327_v54  ;;  %v1690_v0 = vadd.f32 %v271_v45, %v1594_v63 }
 0x14b   :  { %v1282_v2 = vpop.eup %1281  ;;  %v510_v4 = vadd.f32 1.0, %v1280_v1  ;;  %1293 = vtanh.f32 %v453_v57  ;;  %v328_v5 = vmul.f32 %v1687_v58, %v1687_v58  ;;  %v275_v6 = vpop.f32.mrb[16].mxu0  ;;  %v1694_v8 = vadd.f32 1.0, %v1278_v46 }
 0x14c   :  { %v1284_v10 = vpop.eup %1283  ;;  %v511_v11 = vadd.f32 1.0, %v1282_v2  ;;  %v422_v12 = vmul.f32 %v390_v59, %v1666_v31  ;;  %v391_v13 = vadd.f32 1.0, %v359_v60  ;;  %v329_v14 = vmul.f32 %v1690_v0, %v1690_v0  ;;  %v277_v15 = vpop.f32.mrb[17].mxu0 }
 0x14d   :  { %v1286_v16 = vpop.eup %1285  ;;  %v542_v19 = vmul.f32 0.5, %v510_v4  ;;  %v512_v21 = vadd.f32 1.0, %v1284_v10  ;;  %v360_v22 = vmul.f32 0.044715, %v328_v5  ;;  %v1700_v23 = vadd.f32 %v275_v6, %v1592_v62  ;;  %v279_v25 = vpop.f32.mrb[18].mxu0 }
 0x14e   :  { %v543_v26 = vmul.f32 0.5, %v511_v11  ;;  %v513_v27 = vadd.f32 1.0, %v1286_v16  ;;  %v454_v29 = vmul.f32 0.7978846, %v422_v12  ;;  %v423_v30 = vmul.f32 %v391_v13, %v1675_v44  ;;  %v281_v32 = vpop.f32.mrb[19].mxu0 }
 0x14f   :  { %v1704_v35 = vmul.f32 %v542_v19, %v1618_v24  ;;  %v544_v36 = vmul.f32 0.5, %v512_v21  ;;  %v392_v37 = vadd.f32 1.0, %v360_v22  ;;  %v361_v39 = vmul.f32 0.044715, %v329_v14 }
 0x150   :  { %v1707_v40 = vmul.f32 %v543_v26, %v1622_v28  ;;  %v545_v41 = vmul.f32 0.5, %v513_v27  ;;  %1295 = vtanh.f32 %v454_v29  ;;  %v455_v42 = vmul.f32 0.7978846, %v423_v30 }
 0x151   :  { %v1710_v43 = vmul.f32 %v544_v36, %v1628_v33  ;;  %v424_v45 = vmul.f32 %v392_v37, %v1687_v58  ;;  %v393_v46 = vadd.f32 1.0, %v361_v39  ;;  %v330_v48 = vmul.f32 %v1700_v23, %v1700_v23 }
 0x152   :  { %v1288_v24 = vpop.eup %1287  ;;  %v1716_v49 = vmul.f32 %v545_v41, %v1634_v38  ;;  %1297 = vtanh.f32 %v455_v42  ;;  %v1719_v28 = vadd.f32 %v277_v15, %v1594_v63  ;;  %v1722_v50 = vadd.f32 %v279_v25, %v1592_v62 }
 0x153   :  { %v1290_v51 = vpop.eup %1289  ;;  %v514_v33 = vadd.f32 1.0, %v1288_v24  ;;  %v456_v53 = vmul.f32 0.7978846, %v424_v45  ;;  %v425_v54 = vmul.f32 %v393_v46, %v1690_v0  ;;  %v362_v57 = vmul.f32 0.044715, %v330_v48  ;;  %v285_v1 = vpop.f32.mrb[20].mxu0 }
 0x154   :  { %v1292_v59 = vpop.eup %1291  ;;  %v515_v60 = vadd.f32 1.0, %v1290_v51  ;;  %v331_v38 = vmul.f32 %v1719_v28, %v1719_v28  ;;  %v332_v2 = vmul.f32 %v1722_v50, %v1722_v50  ;;  %v1730_v4 = vadd.f32 %v281_v32, %v1594_v63  ;;  %v287_v5 = vpop.f32.mrb[21].mxu0 }
 0x155   :  { %v1294_v6 = vpop.eup %1293  ;;  %v546_v10 = vmul.f32 0.5, %v514_v33  ;;  %v516_v11 = vadd.f32 1.0, %v1292_v59  ;;  %1299 = vtanh.f32 %v456_v53  ;;  %v457_v12 = vmul.f32 0.7978846, %v425_v54  ;;  %v289_v13 = vpop.f32.mrb[22].mxu0 }
 0x156   :  { %v547_v14 = vmul.f32 0.5, %v515_v60  ;;  %v517_v15 = vadd.f32 1.0, %v1294_v6  ;;  %v394_v16 = vadd.f32 1.0, %v362_v57  ;;  %v363_v19 = vmul.f32 0.044715, %v331_v38  ;;  %v291_v21 = vpop.f32.mrb[23].mxu0 }
 0x157   :  { %v1733_v22 = vmul.f32 %v546_v10, %v1642_v52  ;;  %v548_v25 = vmul.f32 0.5, %v516_v11  ;;  %1301 = vtanh.f32 %v457_v12  ;;  %v364_v26 = vmul.f32 0.044715, %v332_v2 }
 0x158   :  { %v1736_v27 = vmul.f32 %v547_v14, %v1646_v56  ;;  %v549_v29 = vmul.f32 0.5, %v517_v15  ;;  %v426_v30 = vmul.f32 %v394_v16, %v1700_v23  ;;  %v395_v32 = vadd.f32 1.0, %v363_v19 }
 0x159   :  { %v1740_v36 = vmul.f32 %v548_v25, %v1652_v61  ;;  %v396_v37 = vadd.f32 1.0, %v364_v26  ;;  %v333_v39 = vmul.f32 %v1730_v4, %v1730_v4  ;;  %v539_v52 = vmul.f32 0.5, %v1668_v34 }
 0x15a   :  { %v1296_v41 = vpop.eup %1295  ;;  %v1746_v42 = vmul.f32 %v549_v29, %v1658_v7  ;;  %v458_v45 = vmul.f32 0.7978846, %v426_v30  ;;  %v427_v56 = vmul.f32 %v395_v32, %v1719_v28  ;;  %v541_v46 = vmul.f32 0.5, %v1694_v8 }
 0x15b   :  { %v518_v48 = vadd.f32 1.0, %v1296_v41  ;;  %v428_v24 = vmul.f32 %v396_v37, %v1722_v50  ;;  %v365_v61 = vmul.f32 0.044715, %v333_v39  ;;  %v571_v51 = vmul.f32 %v539_v52, %v1600_v3  ;;  %v295_v33 = vpop.f32.mrb[24].mxu0 }
 0x15c   :  { %v1298_v53 = vpop.eup %1297  ;;  %1303 = vtanh.f32 %v458_v45  ;;  %v459_v54 = vmul.f32 0.7978846, %v427_v56  ;;  %v573_v34 = vmul.f32 %v541_v46, %v1610_v9  ;;  %v602_v7 = vpack.c.bf16 %v1684_v55, %v1678_v47  ;;  %v297_v57 = vpop.f32.mrb[25].mxu0 }
 0x15d   :  { %v550_v59 = vmul.f32 0.5, %v518_v48  ;;  %v519_v60 = vadd.f32 1.0, %v1298_v53  ;;  %v460_v38 = vmul.f32 0.7978846, %v428_v24  ;;  %v397_v8 = vadd.f32 1.0, %v365_v61  ;;  %v299_v2 = vpop.f32.mrb[26].mxu0 }
 0x15e   :  { %1305 = vtanh.f32 %v459_v54  ;;  %v603_v6 = vpack.c.bf16 %v573_v34, %v571_v51  ;;  %v1756_v10 = vadd.f32 %v285_v1, %v1592_v62  ;;  %v1759_v3 = vadd.f32 %v287_v5, %v1594_v63  ;;  %v1761_v11 = vpop.f32.mrb[27].mxu0 }
 0x15f   :  { %v1300_v9 = vpop.eup %1299  ;;  %v1764_v12 = vmul.f32 %v550_v59, %v1666_v31  ;;  %v551_v47 = vmul.f32 0.5, %v519_v60  ;;  %1307 = vtanh.f32 %v460_v38  ;;  %v429_v55 = vmul.f32 %v397_v8, %v1730_v4 }
 0x160   :  { %v520_v14 = vadd.f32 1.0, %v1300_v9  ;;  %785 = vmatprep.mubr.bf16.mxu1 %v603_v6  ;;  %v334_v15 = vmul.f32 %v1756_v10, %v1756_v10  ;;  %v335_v1 = vmul.f32 %v1759_v3, %v1759_v3  ;;  %v1772_v5 = vadd.f32 %v289_v13, %v1592_v62 }
 0x161   :  { %v1302_v16 = vpop.eup %1301  ;;  %v1775_v19 = vmul.f32 %v551_v47, %v1675_v44  ;;  %v461_v31 = vmul.f32 0.7978846, %v429_v55  ;;  %786 = vmatmul.mubr.bf16.vlgmr.msra.gmra.mrb[0].mxu1 %v602_v7  ;;  %v1778_v25 = vadd.f32 %v291_v21, %v1594_v63  ;;  %v605_v26 = vpack.c.bf16 %v1716_v49, %v1707_v40 }
 0x162   :  { %v552_v29 = vmul.f32 0.5, %v520_v14  ;;  %v521_v30 = vadd.f32 1.0, %v1302_v16  ;;  %v366_v32 = vmul.f32 0.044715, %v334_v15  ;;  %v367_v37 = vmul.f32 0.044715, %v335_v1 }
 0x163   :  { %1309 = vtanh.f32 %v461_v31  ;;  %v336_v13 = vmul.f32 %v1772_v5, %v1772_v5  ;;  %v337_v44 = vmul.f32 %v1778_v25, %v1778_v25  ;;  %793 = vmatprep.mubr.bf16.mxu1 %v605_v26  ;;  %v604_v39 = vpack.c.bf16 %v1710_v43, %v1704_v35  ;;  %v305_v21 = vpop.f32.mrb[28].mxu0 }
 0x164   :  { %v1789_v52 = vmul.f32 %v552_v29, %v1687_v58  ;;  %v553_v40 = vmul.f32 0.5, %v521_v30  ;;  %v398_v49 = vadd.f32 1.0, %v366_v32  ;;  %v399_v41 = vadd.f32 1.0, %v367_v37  ;;  %v307_v45 = vpop.f32.mrb[29].mxu0 }
 0x165   :  { %v368_v56 = vmul.f32 0.044715, %v336_v13  ;;  %v369_v46 = vmul.f32 0.044715, %v337_v44  ;;  %v1792_v48 = vadd.f32 %v295_v33, %v1592_v62  ;;  %v1795_v24 = vadd.f32 %v297_v57, %v1594_v63  ;;  %v309_v61 = vpop.f32.mrb[30].mxu0 }
 0x166   :  { %v1304_v51 = vpop.eup %1303  ;;  %v1798_v35 = vmul.f32 %v553_v40, %v1690_v0  ;;  %v430_v58 = vmul.f32 %v398_v49, %v1756_v10  ;;  %v431_v43 = vmul.f32 %v399_v41, %v1759_v3  ;;  %v1803_v53 = vadd.f32 %v299_v2, %v1592_v62  ;;  %v311_v54 = vpop.f32.mrb[31].mxu0 }
 0x167   :  { %v522_v34 = vadd.f32 1.0, %v1304_v51  ;;  %v400_v7 = vadd.f32 1.0, %v368_v56  ;;  %v401_v33 = vadd.f32 1.0, %v369_v46  ;;  %v338_v57 = vmul.f32 %v1792_v48, %v1792_v48 }
 0x168   :  { %v1306_v59 = vpop.eup %1305  ;;  %v462_v60 = vmul.f32 0.7978846, %v430_v58  ;;  %v463_v38 = vmul.f32 0.7978846, %v431_v43  ;;  %v339_v0 = vmul.f32 %v1795_v24, %v1795_v24  ;;  %v340_v8 = vmul.f32 %v1803_v53, %v1803_v53 }
 0x169   :  { %v1308_v6 = vpop.eup %1307  ;;  %v554_v9 = vmul.f32 0.5, %v522_v34  ;;  %v523_v2 = vadd.f32 1.0, %v1306_v59  ;;  %v432_v47 = vmul.f32 %v400_v7, %v1772_v5  ;;  %v433_v55 = vmul.f32 %v401_v33, %v1778_v25  ;;  %794 = vmatmul.mubr.bf16.gmra.mrb[4].mxu1 %v604_v39 }
 0x16a   :  { %v524_v14 = vadd.f32 1.0, %v1308_v6  ;;  %1311 = vtanh.f32 %v462_v60  ;;  %v370_v15 = vmul.f32 0.044715, %v338_v57  ;;  %v371_v1 = vmul.f32 0.044715, %v339_v0 }
 0x16b   :  { %v1814_v16 = vmul.f32 %v554_v9, %v1700_v23  ;;  %v555_v31 = vmul.f32 0.5, %v523_v2  ;;  %1313 = vtanh.f32 %v463_v38  ;;  %v464_v26 = vmul.f32 0.7978846, %v432_v47 }
 0x16c   :  { %v556_v29 = vmul.f32 0.5, %v524_v14  ;;  %v465_v30 = vmul.f32 0.7978846, %v433_v55  ;;  %v402_v32 = vadd.f32 1.0, %v370_v15  ;;  %v403_v37 = vadd.f32 1.0, %v371_v1 }
 0x16d   :  { %v1310_v13 = vpop.eup %1309  ;;  %v1817_v44 = vmul.f32 %v555_v31, %v1719_v28  ;;  %1315 = vtanh.f32 %v464_v26  ;;  %v372_v39 = vmul.f32 0.044715, %v340_v8  ;;  %v1821_v40 = vadd.f32 %v1761_v11, %v1594_v63 }
 0x16e   :  { %v1824_v23 = vmul.f32 %v556_v29, %v1722_v50  ;;  %v525_v49 = vadd.f32 1.0, %v1310_v13  ;;  %1317 = vtanh.f32 %v465_v30  ;;  %v434_v41 = vmul.f32 %v402_v32, %v1792_v48 }
 0x16f   :  { %v435_v56 = vmul.f32 %v403_v37, %v1795_v24  ;;  %v404_v46 = vadd.f32 1.0, %v372_v39  ;;  %v341_v28 = vmul.f32 %v1821_v40, %v1821_v40  ;;  %v607_v51 = vpack.c.bf16 %v1746_v42, %v1736_v27 }
 0x170   :  { %v557_v58 = vmul.f32 0.5, %v525_v49  ;;  %v466_v43 = vmul.f32 0.7978846, %v434_v41  ;;  %v606_v11 = vpack.c.bf16 %v1740_v36, %v1733_v22  ;;  %v1835_v50 = vadd.f32 %v305_v21, %v1592_v62 }
 0x171   :  { %v467_v34 = vmul.f32 0.7978846, %v435_v56  ;;  %v436_v7 = vmul.f32 %v404_v46, %v1803_v53  ;;  %v373_v33 = vmul.f32 0.044715, %v341_v28  ;;  %801 = vmatprep.mubr.bf16.mxu1 %v607_v51  ;;  %v1839_v57 = vadd.f32 %v307_v45, %v1594_v63 }
 0x172   :  { %v589_v59 = vmul.f32 %v557_v58, %v1730_v4  ;;  %1319 = vtanh.f32 %v466_v43  ;;  %802 = vmatmul.mubr.bf16.gmra.mrb[8].mxu1 %v606_v11  ;;  %v342_v27 = vmul.f32 %v1835_v50, %v1835_v50  ;;  %v1845_v22 = vadd.f32 %v309_v61, %v1592_v62 }
 0x173   :  { %1321 = vtanh.f32 %v467_v34  ;;  %v468_v36 = vmul.f32 0.7978846, %v436_v7  ;;  %v405_v42 = vadd.f32 1.0, %v373_v33  ;;  %v343_v21 = vmul.f32 %v1839_v57, %v1839_v57 }
 0x174   :  { %v1312_v60 = vpop.eup %1311  ;;  %v374_v38 = vmul.f32 0.044715, %v342_v27  ;;  %v344_v45 = vmul.f32 %v1845_v22, %v1845_v22  ;;  %v1852_v4 = vadd.f32 %v311_v54, %v1594_v63  ;;  %v609_v0 = vpack.c.bf16 %v1798_v35, %v1775_v19 }
 0x175   :  { %v1314_v8 = vpop.eup %1313  ;;  %v526_v62 = vadd.f32 1.0, %v1312_v60  ;;  %1323 = vtanh.f32 %v468_v36  ;;  %v437_v61 = vmul.f32 %v405_v42, %v1821_v40  ;;  %v375_v6 = vmul.f32 0.044715, %v343_v21 }
 0x176   :  { %v527_v9 = vadd.f32 1.0, %v1314_v8  ;;  %v406_v2 = vadd.f32 1.0, %v374_v38  ;;  %v376_v47 = vmul.f32 0.044715, %v344_v45  ;;  %v345_v55 = vmul.f32 %v1852_v4, %v1852_v4  ;;  %809 = vmatprep.mubr.bf16.mxu1 %v609_v0 }
 0x177   :  { %v1316_v14 = vpop.eup %1315  ;;  %v558_v15 = vmul.f32 0.5, %v526_v62  ;;  %v469_v63 = vmul.f32 0.7978846, %v437_v61  ;;  %v407_v54 = vadd.f32 1.0, %v375_v6  ;;  %v608_v19 = vpack.c.bf16 %v1789_v52, %v1764_v12 }
 0x178   :  { %v1318_v35 = vpop.eup %1317  ;;  %v559_v1 = vmul.f32 0.5, %v527_v9  ;;  %v528_v31 = vadd.f32 1.0, %v1316_v14  ;;  %v438_v26 = vmul.f32 %v406_v2, %v1835_v50  ;;  %v408_v29 = vadd.f32 1.0, %v376_v47 }
 0x179   :  { %v590_v30 = vmul.f32 %v558_v15, %v1756_v10  ;;  %v529_v32 = vadd.f32 1.0, %v1318_v35  ;;  %1325 = vtanh.f32 %v469_v63  ;;  %v439_v37 = vmul.f32 %v407_v54, %v1839_v57 }
 0x17a   :  { %v591_v13 = vmul.f32 %v559_v1, %v1759_v3  ;;  %v560_v39 = vmul.f32 0.5, %v528_v31  ;;  %v470_v49 = vmul.f32 0.7978846, %v438_v26  ;;  %v440_v41 = vmul.f32 %v408_v29, %v1845_v22  ;;  %810 = vmatmul.mubr.bf16.gmra.mrb[12].mxu1 %v608_v19 }
 0x17b   :  { %v561_v12 = vmul.f32 0.5, %v529_v32  ;;  %v471_v52 = vmul.f32 0.7978846, %v439_v37  ;;  %v377_v56 = vmul.f32 0.044715, %v345_v55  ;;  %v611_v46 = vpack.c.bf16 %v589_v59, %v1817_v44 }
 0x17c   :  { %v1320_v28 = vpop.eup %1319  ;;  %v592_v51 = vmul.f32 %v560_v39, %v1772_v5  ;;  %1327 = vtanh.f32 %v470_v49  ;;  %v472_v10 = vmul.f32 0.7978846, %v440_v41  ;;  %v610_v58 = vpack.c.bf16 %v1824_v23, %v1814_v16 }
 0x17d   :  { %v1322_v43 = vpop.eup %1321  ;;  %v593_v3 = vmul.f32 %v561_v12, %v1778_v25  ;;  %v530_v11 = vadd.f32 1.0, %v1320_v28  ;;  %1329 = vtanh.f32 %v471_v52  ;;  %v409_v34 = vadd.f32 1.0, %v377_v56  ;;  %817 = vmatprep.mubr.bf16.mxu1 %v611_v46 }
 0x17e   :  { %1331 = vtanh.f32 %v472_v10  ;;  %v612_v7 = vpack.c.bf16 %v592_v51, %v590_v30  ;;  %v531_v5 = vadd.f32 1.0, %v1322_v43  ;;  %v1883_v30 = vld [vmem:[%s2109_s4] ss:$0 sm:$0xff] }
 0x17f   :  { %v1324_v33 = vpop.eup %1323  ;;  %v441_v44 = vmul.f32 %v409_v34, %v1852_v4  ;;  %v613_v59 = vpack.c.bf16 %v593_v3, %v591_v13  ;;  %v562_v27 = vmul.f32 0.5, %v530_v11  ;;  %v1367_v3 = vld [vmem:[#allocation2 + $0x18] sm:$0xff] }
 0x180   :  { %v532_v36 = vadd.f32 1.0, %v1324_v33  ;;  %v563_v23 = vmul.f32 0.5, %v531_v5 }
 0x181   :  { %v473_v42 = vmul.f32 0.7978846, %v441_v44  ;;  %v594_v25 = vmul.f32 %v562_v27, %v1792_v48  ;;  %v1368_v27 = vld [vmem:[#allocation2 + $0x20] sm:$0xff] }
 0x182   :  { %v564_v21 = vmul.f32 0.5, %v532_v36  ;;  %818 = vmatmul.mubr.bf16.gmra.mrb[16].mxu1 %v610_v58  ;;  %v595_v9 = vmul.f32 %v563_v23, %v1795_v24  ;;  %v1369_v36 = vld [vmem:[#allocation2 + $0x28] sm:$0xff] }
 0x183   :  { %v1326_v16 = vpop.eup %1325  ;;  %1333 = vtanh.f32 %v473_v42  ;;  %825 = vmatprep.mubr.bf16.mxu1 %v613_v59 }
 0x184   :  { %v596_v60 = vmul.f32 %v564_v21, %v1803_v53  ;;  %v533_v38 = vadd.f32 1.0, %v1326_v16 }
 0x186   :  { %v1328_v45 = vpop.eup %1327  ;;  %v565_v0 = vmul.f32 0.5, %v533_v38  ;;  %v614_v8 = vpack.c.bf16 %v596_v60, %v594_v25 }
 0x187   :  { %v1330_v62 = vpop.eup %1329  ;;  %v534_v61 = vadd.f32 1.0, %v1328_v45 }
 0x188   :  { %v1332_v6 = vpop.eup %1331  ;;  %v597_v2 = vmul.f32 %v565_v0, %v1821_v40  ;;  %v535_v14 = vadd.f32 1.0, %v1330_v62  ;;  %v1370_v0 = vld [vmem:[#allocation2 + $0x30] sm:$0xff] }
 0x189   :  { %v566_v47 = vmul.f32 0.5, %v534_v61  ;;  %v536_v55 = vadd.f32 1.0, %v1332_v6  ;;  %v1371_v61 = vld [vmem:[#allocation2 + $0x38] sm:$0xff] }
 0x18a   :  { %826 = vmatmul.mubr.bf16.gmra.mrb[20].mxu1 %v612_v7  ;;  %v615_v15 = vpack.c.bf16 %v597_v2, %v595_v9  ;;  %v567_v19 = vmul.f32 0.5, %v535_v14 }
 0x18b   :  { %v568_v48 = vmul.f32 0.5, %v536_v55  ;;  %v598_v53 = vmul.f32 %v566_v47, %v1835_v50 }
 0x18c   :  { %833 = vmatprep.mubr.bf16.mxu1 %v615_v15  ;;  %v599_v24 = vmul.f32 %v567_v19, %v1839_v57  ;;  %v1373_v19 = vld [vmem:[#allocation2 + $0x48] sm:$0xff] }
 0x18d   :  { %v1334_v63 = vpop.eup %1333  ;;  %v600_v54 = vmul.f32 %v568_v48, %v1845_v22 }
 0x18e   :  { %v537_v35 = vadd.f32 1.0, %v1334_v63  ;;  %v1372_v63 = vld [vmem:[#allocation2 + $0x40] sm:$0xff] }
 0x18f   :  { %v616_v1 = vpack.c.bf16 %v600_v54, %v598_v53 }
 0x190   :  { %v569_v31 = vmul.f32 0.5, %v537_v35 }
 0x192   :  { %v601_v40 = vmul.f32 %v569_v31, %v1852_v4  ;;  %834 = vmatmul.mubr.bf16.gmra.mrb[24].mxu1 %v614_v8 }
 0x194   :  { %v617_v26 = vpack.c.bf16 %v601_v40, %v599_v24 }
 0x196   :  { %841 = vmatprep.mubr.bf16.mxu1 %v617_v26 }
 0x19a   :  { %842 = vmatmul.mubr.bf16.gmra.mrb[28].mxu1 %v616_v1 }
 0x234   :  { %v1174_v29 = vpop.f32.mrb[0].mxu1 }
 0x235   :  { %v1175_v50 = vpop.f32.mrb[1].mxu1 }
 0x236   :  { %v1176_v22 = vadd.f32 %v1175_v50, %v1174_v29  ;;  %v1177_v32 = vpop.f32.mrb[2].mxu1 }
 0x237   :  { %v1178_v37 = vpop.f32.mrb[3].mxu1 }
 0x238   :  { %v788_v13 = vadd.f32 %v1176_v22, %v1883_v30  ;;  %v1179_v39 = vadd.f32 %v1178_v37, %v1177_v32  ;;  %v1374_v22 = vld [vmem:[#allocation2 + $0x50] sm:$0xff] }
 0x23a   :  { %v791_v57 = vadd.f32 %v1179_v39, %v1883_v30  ;;  %v1888_v4 = vadd.f32 %v788_v13, %v1573_v17  ;;  %v1375_v13 = vld [vmem:[#allocation2 + $0x58] sm:$0xff] }
 0x23c   :  { %v1180_v49 = vpop.f32.mrb[4].mxu1  ;;  %866 = vadd.xlane.f32.xlu0 %v1888_v4  ;;  %v1892_v56 = vadd.f32 %v791_v57, %v1575_v18 }
 0x23d   :  { %v1181_v41 = vpop.f32.mrb[5].mxu1 }
 0x23e   :  { %v1182_v12 = vadd.f32 %v1181_v41, %v1180_v49  ;;  %v1183_v52 = vpop.f32.mrb[6].mxu1 }
 0x23f   :  { %v1184_v46 = vpop.f32.mrb[7].mxu1 }
 0x240   :  { %v796_v28 = vadd.f32 %v1182_v12, %v1883_v30  ;;  %v1185_v51 = vadd.f32 %v1184_v46, %v1183_v52  ;;  %868 = vadd.xlane.f32.xlu0 %v1892_v56 }
 0x242   :  { %v799_v10 = vadd.f32 %v1185_v51, %v1883_v30  ;;  %v1898_v17 = vadd.f32 %v796_v28, %v1580_v20  ;;  %v1376_v51 = vld [vmem:[#allocation2 + $0x60] sm:$0xff] }
 0x244   :  { %870 = vadd.xlane.f32.xlu1 %v1898_v17  ;;  %v1901_v11 = vadd.f32 %v1367_v3, %v799_v10 }
 0x245   :  { %v1186_v58 = vpop.f32.mrb[8].mxu1 }
 0x246   :  { %v1187_v43 = vpop.f32.mrb[9].mxu1 }
 0x247   :  { %v1188_v18 = vadd.f32 %v1187_v43, %v1186_v58  ;;  %v1189_v34 = vpop.f32.mrb[10].mxu1  ;;  %v1377_v43 = vld [vmem:[#allocation2 + $0x68] sm:$0xff] }
 0x248   :  { %v1190_v7 = vpop.f32.mrb[11].mxu1  ;;  %872 = vadd.xlane.f32.xlu1 %v1901_v11 }
 0x249   :  { %v804_v33 = vadd.f32 %v1188_v18, %v1883_v30  ;;  %v1191_v44 = vadd.f32 %v1190_v7, %v1189_v34 }
 0x24b   :  { %v807_v59 = vadd.f32 %v1191_v44, %v1883_v30  ;;  %v1906_v20 = vadd.f32 %v1368_v27, %v804_v33 }
 0x24d   :  { %v1192_v5 = vpop.f32.mrb[12].mxu1  ;;  %874 = vadd.xlane.f32.xlu0 %v1906_v20  ;;  %v1909_v42 = vadd.f32 %v1369_v36, %v807_v59 }
 0x24e   :  { %v1193_v21 = vpop.f32.mrb[13].mxu1 }
 0x24f   :  { %v1194_v16 = vadd.f32 %v1193_v21, %v1192_v5  ;;  %v1195_v25 = vpop.f32.mrb[14].mxu1  ;;  %876 = vadd.xlane.f32.xlu1 %v1909_v42  ;;  %v1378_v5 = vld [vmem:[#allocation2 + $0x70] sm:$0xff]  ;;  %v1379_v21 = vld [vmem:[#allocation2 + $0x78] sm:$0xff] }
 0x250   :  { %v1196_v23 = vpop.f32.mrb[15].mxu1 }
 0x251   :  { %v812_v60 = vadd.f32 %v1194_v16, %v1883_v30  ;;  %v1197_v38 = vadd.f32 %v1196_v23, %v1195_v25 }
 0x253   :  { %v815_v45 = vadd.f32 %v1197_v38, %v1883_v30  ;;  %v1914_v8 = vadd.f32 %v1370_v0, %v812_v60 }
 0x255   :  { %v1198_v62 = vpop.f32.mrb[16].mxu1  ;;  %878 = vadd.xlane.f32.xlu0 %v1914_v8  ;;  %v1917_v6 = vadd.f32 %v1371_v61, %v815_v45 }
 0x256   :  { %v1199_v9 = vpop.f32.mrb[17].mxu1 }
 0x257   :  { %v1200_v2 = vadd.f32 %v1199_v9, %v1198_v62  ;;  %v1201_v47 = vpop.f32.mrb[18].mxu1  ;;  %880 = vadd.xlane.f32.xlu1 %v1917_v6 }
 0x258   :  { %v1202_v55 = vpop.f32.mrb[19].mxu1 }
 0x259   :  { %v820_v14 = vadd.f32 %v1200_v2, %v1883_v30  ;;  %v1203_v15 = vadd.f32 %v1202_v55, %v1201_v47 }
 0x25b   :  { %v823_v48 = vadd.f32 %v1203_v15, %v1883_v30  ;;  %v1922_v53 = vadd.f32 %v1372_v63, %v820_v14 }
 0x25d   :  { %v1204_v54 = vpop.f32.mrb[20].mxu1  ;;  %882 = vadd.xlane.f32.xlu0 %v1922_v53  ;;  %v1925_v35 = vadd.f32 %v1373_v19, %v823_v48 }
 0x25e   :  { %v1205_v1 = vpop.f32.mrb[21].mxu1 }
 0x25f   :  { %v1206_v31 = vadd.f32 %v1205_v1, %v1204_v54  ;;  %v1207_v24 = vpop.f32.mrb[22].mxu1  ;;  %884 = vadd.xlane.f32.xlu1 %v1925_v35 }
 0x260   :  { %v1208_v40 = vpop.f32.mrb[23].mxu1 }
 0x261   :  { %v828_v26 = vadd.f32 %v1206_v31, %v1883_v30  ;;  %v1209_v29 = vadd.f32 %v1208_v40, %v1207_v24 }
 0x263   :  { %v831_v50 = vadd.f32 %v1209_v29, %v1883_v30  ;;  %v1930_v32 = vadd.f32 %v1374_v22, %v828_v26 }
 0x265   :  { %v1210_v37 = vpop.f32.mrb[24].mxu1  ;;  %886 = vadd.xlane.f32.xlu0 %v1930_v32  ;;  %v1933_v39 = vadd.f32 %v1375_v13, %v831_v50 }
 0x266   :  { %v1211_v57 = vpop.f32.mrb[25].mxu1 }
 0x267   :  { %v1212_v49 = vadd.f32 %v1211_v57, %v1210_v37  ;;  %v1213_v41 = vpop.f32.mrb[26].mxu1  ;;  %888 = vadd.xlane.f32.xlu1 %v1933_v39 }
 0x268   :  { %v1214_v12 = vpop.f32.mrb[27].mxu1 }
 0x269   :  { %v836_v52 = vadd.f32 %v1212_v49, %v1883_v30  ;;  %v1215_v46 = vadd.f32 %v1214_v12, %v1213_v41 }
 0x26b   :  { %v839_v28 = vadd.f32 %v1215_v46, %v1883_v30  ;;  %v1938_v10 = vadd.f32 %v1376_v51, %v836_v52 }
 0x26d   :  { %v1216_v58 = vpop.f32.mrb[28].mxu1  ;;  %890 = vadd.xlane.f32.xlu0 %v1938_v10  ;;  %v1941_v3 = vadd.f32 %v1377_v43, %v839_v28 }
 0x26e   :  { %v1217_v18 = vpop.f32.mrb[29].mxu1 }
 0x26f   :  { %v1218_v34 = vadd.f32 %v1217_v18, %v1216_v58  ;;  %v1219_v7 = vpop.f32.mrb[30].mxu1  ;;  %892 = vadd.xlane.f32.xlu1 %v1941_v3 }
 0x270   :  { %v1220_v33 = vpop.f32.mrb[31].mxu1 }
 0x271   :  { %v844_v44 = vadd.f32 %v1218_v34, %v1883_v30  ;;  %v1221_v59 = vadd.f32 %v1220_v33, %v1219_v7 }
 0x273   :  { %v847_v27 = vadd.f32 %v1221_v59, %v1883_v30  ;;  %v1946_v36 = vadd.f32 %v1378_v5, %v844_v44 }
 0x275   :  { %894 = vadd.xlane.f32.xlu0 %v1946_v36  ;;  %v1949_v16 = vadd.f32 %v1379_v21, %v847_v27 }
 0x277   :  { %896 = vadd.xlane.f32.xlu1 %v1949_v16 }
 0x2c9   :  { %v867_v25 = vpop.xlane.xlu0 %866 }
 0x2ca   :  { %v899_v23 = vmul.f32 0.0078125, %v867_v25 }
 0x2cc   :  { %v1953_v60 = vsub.f32 %v1888_v4, %v899_v23 }
 0x2cd   :  { %v869_v38 = vpop.xlane.xlu0 %868 }
 0x2ce   :  { %v900_v45 = vmul.f32 0.0078125, %v869_v38  ;;  %v931_v30 = vmul.f32 %v1953_v60, %v1953_v60 }
 0x2d0   :  { %v1958_v0 = vsub.f32 %v1892_v56, %v900_v45  ;;  %947 = vadd.xlane.f32.xlu0 %v931_v30 }
 0x2d1   :  { %v871_v62 = vpop.xlane.xlu1 %870 }
 0x2d2   :  { %v901_v61 = vmul.f32 0.0078125, %v871_v62  ;;  %v932_v9 = vmul.f32 %v1958_v0, %v1958_v0 }
 0x2d4   :  { %v1963_v2 = vsub.f32 %v1898_v17, %v901_v61  ;;  %949 = vadd.xlane.f32.xlu1 %v932_v9 }
 0x2d5   :  { %v873_v4 = vpop.xlane.xlu1 %872 }
 0x2d6   :  { %v902_v47 = vmul.f32 0.0078125, %v873_v4  ;;  %v933_v55 = vmul.f32 %v1963_v2, %v1963_v2 }
 0x2d8   :  { %v1968_v14 = vsub.f32 %v1901_v11, %v902_v47  ;;  %951 = vadd.xlane.f32.xlu0 %v933_v55 }
 0x2da   :  { %v875_v56 = vpop.xlane.xlu0 %874  ;;  %v934_v15 = vmul.f32 %v1968_v14, %v1968_v14 }
 0x2db   :  { %v903_v48 = vmul.f32 0.0078125, %v875_v56 }
 0x2dc   :  { %v877_v63 = vpop.xlane.xlu1 %876  ;;  %953 = vadd.xlane.f32.xlu1 %v934_v15  ;;  %v2035_v15 = vld [vmem:[%s2110_s5] ss:$0 sm:$0xff]  ;;  %s1482_s5 = smov [#allocation8]  }
 0x2dd   :  { %v1973_v17 = vsub.f32 %v1906_v20, %v903_v48  ;;  %v904_v54 = vmul.f32 0.0078125, %v877_v63 }
 0x2df   :  { %v1976_v19 = vsub.f32 %v1909_v42, %v904_v54  ;;  %v935_v1 = vmul.f32 %v1973_v17, %v1973_v17  ;;  %v2041_v54 = vld [vmem:[%s2111_s6] ss:$0 sm:$0xff]  ;;  %s1110_s6 = sshll.u32 %s1482_s5, 4  ;;  %s1111_s6 = int_to_ptr.vmem [resolvable:$true] %s1110_s6 }
 0x2e0   :  { %s1446_s23 = scalar_lea.vmem %s1111_s6, 2048  ;;  %p1451_p11 = scmp.lt.s32.totalorder %s1111_s6, %s1111_s6 }
 0x2e1   :  { %955 = vadd.xlane.f32.xlu0 %v935_v1  ;;  %v936_v11 = vmul.f32 %v1976_v19, %v1976_v19  ;;  %p1447_p10 = scmp.ne.s32.totalorder %s1111_s6, %s1446_s23  ;;  %p1452_p12 = scmp.lt.s32.totalorder %s1446_s23, %s1446_s23 }
 0x2e2   :  { %v879_v31 = vpop.xlane.xlu0 %878 }
 0x2e3   :  { %v905_v24 = vmul.f32 0.0078125, %v879_v31  ;;  %957 = vadd.xlane.f32.xlu1 %v936_v11  ;;  %p1453_p13 = por %p1452_p12, %p1451_p11 }
 0x2e4   :  { %v881_v40 = vpop.xlane.xlu1 %880 }
 0x2e5   :  { %v1983_v26 = vsub.f32 %v1914_v8, %v905_v24  ;;  %v906_v20 = vmul.f32 0.0078125, %v881_v40  ;;  %p1454_p0 = pnand %p1453_p13, %p1447_p10 }
 0x2e7   :  { %v1986_v29 = vsub.f32 %v1917_v6, %v906_v20  ;;  %v937_v42 = vmul.f32 %v1983_v26, %v1983_v26 }
 0x2e9   :  { %959 = vadd.xlane.f32.xlu0 %v937_v42  ;;  %v938_v50 = vmul.f32 %v1986_v29, %v1986_v29 }
 0x2ea   :  { %v883_v22 = vpop.xlane.xlu0 %882 }
 0x2eb   :  { %v907_v37 = vmul.f32 0.0078125, %v883_v22  ;;  %961 = vadd.xlane.f32.xlu1 %v938_v50 }
 0x2ec   :  { %v885_v13 = vpop.xlane.xlu1 %884 }
 0x2ed   :  { %v1993_v57 = vsub.f32 %v1922_v53, %v907_v37  ;;  %v908_v8 = vmul.f32 0.0078125, %v885_v13 }
 0x2ef   :  { %v1996_v49 = vsub.f32 %v1925_v35, %v908_v8  ;;  %v939_v6 = vmul.f32 %v1993_v57, %v1993_v57 }
 0x2f1   :  { %963 = vadd.xlane.f32.xlu0 %v939_v6  ;;  %v940_v41 = vmul.f32 %v1996_v49, %v1996_v49 }
 0x2f2   :  { %v887_v12 = vpop.xlane.xlu0 %886 }
 0x2f3   :  { %v909_v52 = vmul.f32 0.0078125, %v887_v12  ;;  %965 = vadd.xlane.f32.xlu1 %v940_v41 }
 0x2f4   :  { %v889_v46 = vpop.xlane.xlu1 %888 }
 0x2f5   :  { %v2003_v28 = vsub.f32 %v1930_v32, %v909_v52  ;;  %v910_v53 = vmul.f32 0.0078125, %v889_v46 }
 0x2f7   :  { %v2006_v51 = vsub.f32 %v1933_v39, %v910_v53  ;;  %v941_v35 = vmul.f32 %v2003_v28, %v2003_v28 }
 0x2f9   :  { %967 = vadd.xlane.f32.xlu0 %v941_v35  ;;  %v942_v58 = vmul.f32 %v2006_v51, %v2006_v51 }
 0x2fa   :  { %v891_v43 = vpop.xlane.xlu0 %890 }
 0x2fb   :  { %v911_v18 = vmul.f32 0.0078125, %v891_v43  ;;  %969 = vadd.xlane.f32.xlu1 %v942_v58 }
 0x2fc   :  { %v893_v34 = vpop.xlane.xlu1 %892 }
 0x2fd   :  { %v2013_v7 = vsub.f32 %v1938_v10, %v911_v18  ;;  %v912_v32 = vmul.f32 0.0078125, %v893_v34 }
 0x2ff   :  { %v2016_v33 = vsub.f32 %v1941_v3, %v912_v32  ;;  %v943_v39 = vmul.f32 %v2013_v7, %v2013_v7 }
 0x301   :  { %971 = vadd.xlane.f32.xlu0 %v943_v39  ;;  %v944_v44 = vmul.f32 %v2016_v33, %v2016_v33 }
 0x302   :  { %v895_v59 = vpop.xlane.xlu0 %894 }
 0x303   :  { %v913_v27 = vmul.f32 0.0078125, %v895_v59  ;;  %973 = vadd.xlane.f32.xlu1 %v944_v44 }
 0x304   :  { %v897_v5 = vpop.xlane.xlu1 %896 }
 0x305   :  { %v2023_v21 = vsub.f32 %v1946_v36, %v913_v27  ;;  %v914_v10 = vmul.f32 0.0078125, %v897_v5 }
 0x307   :  { %v2026_v25 = vsub.f32 %v1949_v16, %v914_v10  ;;  %v945_v3 = vmul.f32 %v2023_v21, %v2023_v21 }
 0x309   :  { %975 = vadd.xlane.f32.xlu0 %v945_v3  ;;  %v946_v23 = vmul.f32 %v2026_v25, %v2026_v25 }
 0x30b   :  { %977 = vadd.xlane.f32.xlu1 %v946_v23 }
 0x35d   :  { %v948_v38 = vpop.xlane.xlu0 %947 }
 0x35e   :  { %v979_v45 = vmul.f32 0.0078125, %v948_v38 }
 0x360   :  { %v995_v30 = vadd.f32 1e-12, %v979_v45 }
 0x361   :  { %v950_v62 = vpop.xlane.xlu1 %949 }
 0x362   :  { %1335 = vrsqrt.f32 %v995_v30  ;;  %v980_v61 = vmul.f32 0.0078125, %v950_v62 }
 0x364   :  { %v996_v36 = vadd.f32 1e-12, %v980_v61 }
 0x365   :  { %v952_v9 = vpop.xlane.xlu0 %951 }
 0x366   :  { %1337 = vrsqrt.f32 %v996_v36  ;;  %v981_v4 = vmul.f32 0.0078125, %v952_v9 }
 0x368   :  { %v997_v16 = vadd.f32 1e-12, %v981_v4 }
 0x369   :  { %v954_v47 = vpop.xlane.xlu1 %953 }
 0x36a   :  { %1339 = vrsqrt.f32 %v997_v16  ;;  %v982_v55 = vmul.f32 0.0078125, %v954_v47 }
 0x36c   :  { %v1336_v56 = vpop.eup %1335  ;;  %v998_v48 = vadd.f32 1e-12, %v982_v55 }
 0x36d   :  { %v1027_v63 = vmul.f32 %v1336_v56, %v1953_v60 }
 0x36e   :  { %1341 = vrsqrt.f32 %v998_v48  ;;  %v956_v1 = vpop.xlane.xlu0 %955 }
 0x36f   :  { %v1050_v11 = vmul.f32 %v2035_v15, %v1027_v63  ;;  %v983_v31 = vmul.f32 0.0078125, %v956_v1 }
 0x370   :  { %v1338_v24 = vpop.eup %1337  ;;  %v958_v40 = vpop.xlane.xlu1 %957 }
 0x371   :  { %v1073_v20 = vadd.f32 %v2041_v54, %v1050_v11  ;;  %v1028_v42 = vmul.f32 %v1338_v24, %v1958_v0  ;;  %v999_v50 = vadd.f32 1e-12, %v983_v31  ;;  %v984_v22 = vmul.f32 0.0078125, %v958_v40 }
 0x373   :  { %1089 = vst [vmem:[#allocation8] sm:$0xff] %v1073_v20  ;;  %v1051_v60 = vmul.f32 %v2035_v15, %v1028_v42  ;;  %1343 = vrsqrt.f32 %v999_v50  ;;  %v1000_v37 = vadd.f32 1e-12, %v984_v22 }
 0x374   :  { %v1340_v13 = vpop.eup %1339 }
 0x375   :  { %v1074_v8 = vadd.f32 %v2041_v54, %v1051_v60  ;;  %v1029_v6 = vmul.f32 %v1340_v13, %v1963_v2  ;;  %1345 = vrsqrt.f32 %v1000_v37 }
 0x376   :  { %v960_v41 = vpop.xlane.xlu0 %959 }
 0x377   :  { %1090 = vst [vmem:[#allocation8 + $0x8] sm:$0xff] %v1074_v8  ;;  %v1052_v12 = vmul.f32 %v2035_v15, %v1029_v6  ;;  %v985_v52 = vmul.f32 0.0078125, %v960_v41 }
 0x378   :  { %v1342_v46 = vpop.eup %1341  ;;  %v962_v0 = vpop.xlane.xlu1 %961 }
 0x379   :  { %v1075_v53 = vadd.f32 %v2041_v54, %v1052_v12  ;;  %v1030_v35 = vmul.f32 %v1342_v46, %v1968_v14  ;;  %v1001_v58 = vadd.f32 1e-12, %v985_v52  ;;  %v986_v43 = vmul.f32 0.0078125, %v962_v0 }
 0x37b   :  { %1091 = vst [vmem:[#allocation8 + $0x10] sm:$0xff] %v1075_v53  ;;  %v1053_v18 = vmul.f32 %v2035_v15, %v1030_v35  ;;  %1347 = vrsqrt.f32 %v1001_v58  ;;  %v1002_v34 = vadd.f32 1e-12, %v986_v43 }
 0x37d   :  { %v1344_v2 = vpop.eup %1343  ;;  %v1076_v32 = vadd.f32 %v2041_v54, %v1053_v18  ;;  %1349 = vrsqrt.f32 %v1002_v34 }
 0x37e   :  { %v1031_v39 = vmul.f32 %v1344_v2, %v1973_v17  ;;  %v964_v44 = vpop.xlane.xlu0 %963 }
 0x37f   :  { %v1346_v59 = vpop.eup %1345  ;;  %1092 = vst [vmem:[#allocation8 + $0x18] sm:$0xff] %v1076_v32  ;;  %v987_v27 = vmul.f32 0.0078125, %v964_v44 }
 0x380   :  { %v1054_v5 = vmul.f32 %v2035_v15, %v1031_v39  ;;  %v1032_v14 = vmul.f32 %v1346_v59, %v1976_v19  ;;  %v966_v10 = vpop.xlane.xlu1 %965 }
 0x381   :  { %v1003_v3 = vadd.f32 1e-12, %v987_v27  ;;  %v988_v23 = vmul.f32 0.0078125, %v966_v10 }
 0x382   :  { %v1077_v38 = vadd.f32 %v2041_v54, %v1054_v5  ;;  %v1055_v45 = vmul.f32 %v2035_v15, %v1032_v14 }
 0x383   :  { %1351 = vrsqrt.f32 %v1003_v3  ;;  %v1004_v30 = vadd.f32 1e-12, %v988_v23 }
 0x384   :  { %1093 = vst [vmem:[#allocation8 + $0x20] sm:$0xff] %v1077_v38  ;;  %v1078_v17 = vadd.f32 %v2041_v54, %v1055_v45 }
 0x385   :  { %v1348_v62 = vpop.eup %1347  ;;  %1353 = vrsqrt.f32 %v1004_v30 }
 0x386   :  { %1094 = vst [vmem:[#allocation8 + $0x28] sm:$0xff] %v1078_v17  ;;  %v1033_v61 = vmul.f32 %v1348_v62, %v1983_v26  ;;  %v968_v36 = vpop.xlane.xlu0 %967 }
 0x387   :  { %v1350_v9 = vpop.eup %1349  ;;  %v989_v19 = vmul.f32 0.0078125, %v968_v36 }
 0x388   :  { %v1056_v4 = vmul.f32 %v2035_v15, %v1033_v61  ;;  %v1034_v16 = vmul.f32 %v1350_v9, %v1986_v29  ;;  %v970_v47 = vpop.xlane.xlu1 %969 }
 0x389   :  { %v1005_v55 = vadd.f32 1e-12, %v989_v19  ;;  %v990_v56 = vmul.f32 0.0078125, %v970_v47 }
 0x38a   :  { %v1079_v48 = vadd.f32 %v2041_v54, %v1056_v4  ;;  %v1057_v63 = vmul.f32 %v2035_v15, %v1034_v16 }
 0x38b   :  { %1355 = vrsqrt.f32 %v1005_v55  ;;  %v1006_v1 = vadd.f32 1e-12, %v990_v56 }
 0x38c   :  { %1095 = vst [vmem:[#allocation8 + $0x30] sm:$0xff] %v1079_v48  ;;  %v1080_v11 = vadd.f32 %v2041_v54, %v1057_v63 }
 0x38d   :  { %v1352_v26 = vpop.eup %1351  ;;  %1357 = vrsqrt.f32 %v1006_v1 }
 0x38e   :  { %1096 = vst [vmem:[#allocation8 + $0x38] sm:$0xff] %v1080_v11  ;;  %v1035_v31 = vmul.f32 %v1352_v26, %v1993_v57  ;;  %v972_v24 = vpop.xlane.xlu0 %971 }
 0x38f   :  { %v1354_v40 = vpop.eup %1353  ;;  %v991_v29 = vmul.f32 0.0078125, %v972_v24 }
 0x390   :  { %v1058_v20 = vmul.f32 %v2035_v15, %v1035_v31  ;;  %v1036_v42 = vmul.f32 %v1354_v40, %v1996_v49  ;;  %v974_v50 = vpop.xlane.xlu1 %973 }
 0x391   :  { %v1007_v22 = vadd.f32 1e-12, %v991_v29  ;;  %v992_v60 = vmul.f32 0.0078125, %v974_v50 }
 0x392   :  { %v1081_v37 = vadd.f32 %v2041_v54, %v1058_v20  ;;  %v1059_v13 = vmul.f32 %v2035_v15, %v1036_v42 }
 0x393   :  { %1359 = vrsqrt.f32 %v1007_v22  ;;  %v1008_v8 = vadd.f32 1e-12, %v992_v60 }
 0x394   :  { %1097 = vst [vmem:[#allocation8 + $0x40] sm:$0xff] %v1081_v37  ;;  %v1082_v6 = vadd.f32 %v2041_v54, %v1059_v13 }
 0x395   :  { %v1356_v57 = vpop.eup %1355  ;;  %1361 = vrsqrt.f32 %v1008_v8 }
 0x396   :  { %1098 = vst [vmem:[#allocation8 + $0x48] sm:$0xff] %v1082_v6  ;;  %v1037_v41 = vmul.f32 %v1356_v57, %v2003_v28  ;;  %v976_v12 = vpop.xlane.xlu0 %975 }
 0x397   :  { %v1358_v52 = vpop.eup %1357  ;;  %v993_v49 = vmul.f32 0.0078125, %v976_v12 }
 0x398   :  { %v1060_v46 = vmul.f32 %v2035_v15, %v1037_v41  ;;  %v1038_v0 = vmul.f32 %v1358_v52, %v2006_v51  ;;  %v978_v53 = vpop.xlane.xlu1 %977 }
 0x399   :  { %v1009_v35 = vadd.f32 1e-12, %v993_v49  ;;  %v994_v58 = vmul.f32 0.0078125, %v978_v53 }
 0x39a   :  { %v1083_v43 = vadd.f32 %v2041_v54, %v1060_v46  ;;  %v1061_v18 = vmul.f32 %v2035_v15, %v1038_v0 }
 0x39b   :  { %1363 = vrsqrt.f32 %v1009_v35  ;;  %v1010_v34 = vadd.f32 1e-12, %v994_v58 }
 0x39c   :  { %1099 = vst [vmem:[#allocation8 + $0x50] sm:$0xff] %v1083_v43  ;;  %v1084_v2 = vadd.f32 %v2041_v54, %v1061_v18 }
 0x39d   :  { %v1360_v28 = vpop.eup %1359  ;;  %1365 = vrsqrt.f32 %v1010_v34 }
 0x39e   :  { %1100 = vst [vmem:[#allocation8 + $0x58] sm:$0xff] %v1084_v2  ;;  %v1039_v32 = vmul.f32 %v1360_v28, %v2013_v7 }
 0x39f   :  { %v1362_v39 = vpop.eup %1361 }
 0x3a0   :  { %v1062_v51 = vmul.f32 %v2035_v15, %v1039_v32  ;;  %v1040_v44 = vmul.f32 %v1362_v39, %v2016_v33 }
 0x3a2   :  { %v1085_v59 = vadd.f32 %v2041_v54, %v1062_v51  ;;  %v1063_v27 = vmul.f32 %v2035_v15, %v1040_v44 }
 0x3a4   :  { %1101 = vst [vmem:[#allocation8 + $0x60] sm:$0xff] %v1085_v59  ;;  %v1086_v5 = vadd.f32 %v2041_v54, %v1063_v27 }
 0x3a5   :  { %v1364_v14 = vpop.eup %1363 }
 0x3a6   :  { %1102 = vst [vmem:[#allocation8 + $0x68] sm:$0xff] %v1086_v5  ;;  %v1041_v10 = vmul.f32 %v1364_v14, %v2023_v21 }
 0x3a7   :  { %v1366_v3 = vpop.eup %1365 }
 0x3a8   :  { %v1064_v23 = vmul.f32 %v2035_v15, %v1041_v10  ;;  %v1042_v7 = vmul.f32 %v1366_v3, %v2026_v25 }
 0x3aa   :  { %v1087_v33 = vadd.f32 %v2041_v54, %v1064_v23  ;;  %v1065_v38 = vmul.f32 %v2035_v15, %v1042_v7 }
 0x3ac   :  { %1103 = vst [vmem:[#allocation8 + $0x70] sm:$0xff] %v1087_v33  ;;  %v1088_v45 = vadd.f32 %v2041_v54, %v1065_v38 }
 0x3ae   :  { %1104 = vst [vmem:[#allocation8 + $0x78] sm:$0xff] %v1088_v45 }
 0x3af   :  { %1457 = shalt.err (!%p1454_p0)
}
 0x3b0   :  { %s1458_s25 = scalar_lea.hbm %s2112_s7, 2048 }
 0x3b1   :  { %p1459_p1 = scmp.ne.s32.totalorder %s2112_s7, %s1458_s25  ;;  %p1462_p2 = scmp.lt.u32.totalorder %s1458_s25, %s2112_s7 }
 0x3b3   :  { %p1464_p3 = pnand %p1462_p2, %p1459_p1 }
 0x3b5   :  { %1467 = shalt.err (!%p1464_p3)
}
 0x3b6   :  { %1116 = dma.vmem_to_hbm [thread:$0]  %s1111_s6, 2048, %s2112_s7, [#allocation4], %s1476_s13, %s1476_s13, %s1477_s14  }
 0x3b7   :  { %1472 = dma.done.wait [#allocation4], 2048  }
 0x3b8   :  { %1473 = vsyncadd [#allocation4], 4294965248 }
 0x3b9   :  { %1120 = vsyncpa [#allocation3], 1 }
 0x3ba   :  { %1121 = vsyncpa [#allocation6], 1 }
 0x3bb   :  { %1122 = vsyncpa [#allocation4], 1 }

</bundles_post_ra>
